<compile_context>
chip_gen: v6e
topology: v6e:2x2x1
jax: 0.10.0
libtpu: 0.0.40
codegen_flags: <defaults>
</compile_context>

<pallas_src>
import functools
import math

import jax
import jax.numpy as jnp
from jax.experimental import pallas as pl
from jax.experimental.pallas import tpu as pltpu


# Operand dtype fed to the MXU (accumulation is always f32).
MXU_DTYPE = jnp.bfloat16


# ----------------------------------------------------------------------------
# Config (small synthetic sizes consistent with the GPT2 forward structure).
# ----------------------------------------------------------------------------
class GPT2Config:
    def __init__(self,
                 vocab_size=256,
                 max_position_embeddings=64,
                 hidden_size=32,
                 num_hidden_layers=2,
                 intermediate_size=128,
                 layer_norm_epsilon=1e-5,
                 num_heads=4):
        self.vocab_size = vocab_size
        self.max_position_embeddings = max_position_embeddings
        self.hidden_size = hidden_size
        self.num_hidden_layers = num_hidden_layers
        self.intermediate_size = intermediate_size
        self.layer_norm_epsilon = layer_norm_epsilon
        self.num_heads = num_heads
        self.head_dim = hidden_size // num_heads
        assert self.head_dim * num_heads == hidden_size


# ----------------------------------------------------------------------------
# Fused per-layer kernel. grid = (num_layers,), axis marked "arbitrary".
# hidden_ref (output with a constant block index) carries the residual stream
# in VMEM across grid steps.  new_k_ref / new_v_ref are the [P:T] row-blocks
# of the aliased KV cache (in-place append).
# ----------------------------------------------------------------------------
def _gpt2_fused_kernel(emb_ref,
                       ln1_g_ref, ln1_b_ref,
                       c_attn_w_ref, c_attn_b_ref,
                       attn_proj_w_ref, attn_proj_b_ref,
                       ln2_g_ref, ln2_b_ref,
                       c_fc_w_ref, c_fc_b_ref,
                       mlp_proj_w_ref, mlp_proj_b_ref,
                       lnf_g_ref, lnf_b_ref,
                       past_k_ref, past_v_ref,
                       hidden_ref, new_k_ref, new_v_ref,
                       k_slab_ref, v_slab_ref, attn_buf_ref,
                       *, num_heads, head_dim, eps):
    layer = pl.program_id(0)
    num_layers = pl.num_programs(0)

    S, H = hidden_ref.shape
    P = past_k_ref.shape[1]          # previous (cached) sequence length
    T = P + S                        # total key/value length
    scale = 1.0 / math.sqrt(head_dim)

    # Layer 0: seed the resident hidden state from the embeddings.
    @pl.when(layer == 0)
    def _():
        hidden_ref[...] = emb_ref[...]

    def layer_norm(x, g, b):
        mean = jnp.mean(x, axis=-1, keepdims=True)
        cen = x - mean
        var = jnp.mean(cen * cen, axis=-1, keepdims=True)
        return cen * jax.lax.rsqrt(var + eps) * g + b

    def matmul(x, w):
        return jnp.dot(x.astype(MXU_DTYPE), w.astype(MXU_DTYPE),
                       preferred_element_type=jnp.float32)

    hidden = hidden_ref[...].astype(jnp.float32)

    # ------------------------- attention sub-block --------------------------
    x = layer_norm(hidden, ln1_g_ref[0], ln1_b_ref[0])
    qkv = matmul(x, c_attn_w_ref[0]) + c_attn_b_ref[0]          # [S, 3H]
    q = qkv[:, 0 * H:1 * H]                                      # [S, H]
    k = qkv[:, 1 * H:2 * H]
    v = qkv[:, 2 * H:3 * H]

    # Assemble lane-dense [T, H] K/V slabs in VMEM scratch: past rows [0:P]
    # copied from the cache block, new rows written at [P:T].  No concats.
    k_slab_ref[pl.ds(0, P), :] = past_k_ref[0]
    k_slab_ref[pl.ds(P, S), :] = k
    v_slab_ref[pl.ds(0, P), :] = past_v_ref[0]
    v_slab_ref[pl.ds(P, S), :] = v

    # Causal mask (boolean, folded via jnp.where): key j valid iff j <= i + P.
    qi = jax.lax.broadcasted_iota(jnp.int32, (S, T), 0)
    kj = jax.lax.broadcasted_iota(jnp.int32, (S, T), 1)
    keep = kj <= qi + P                                          # [S, T]

    # Per-head attention (statically unrolled for toy NH=4); each head's
    # [S, D] output lands in the lane-dense attn scratch at its head offset.
    for h in range(num_heads):
        lo = h * head_dim
        hi = lo + head_dim
        qh = q[:, lo:hi]                                         # [S, D]
        kh = k_slab_ref[:, lo:hi]                                # [T, D]
        vh = v_slab_ref[:, lo:hi]
        s = jax.lax.dot_general(qh.astype(MXU_DTYPE), kh.astype(MXU_DTYPE),
                                (((1,), (1,)), ((), ())),
                                preferred_element_type=jnp.float32) * scale
        s = jnp.where(keep, s, jnp.float32(-1e30))               # [S, T]
        m = jnp.max(s, axis=-1, keepdims=True)
        p = jnp.exp(s - m)
        denom = jnp.sum(p, axis=-1, keepdims=True)
        p = p * pl.reciprocal(denom, approx=True)                # EUP slot
        attn_buf_ref[:, lo:hi] = jnp.dot(
            p.astype(MXU_DTYPE), vh.astype(MXU_DTYPE),
            preferred_element_type=jnp.float32)                  # [S, D]

    attn = matmul(attn_buf_ref[...], attn_proj_w_ref[0]) + attn_proj_b_ref[0]
    hidden = hidden + attn                                       # residual add

    # ---------------------------- MLP sub-block -----------------------------
    x2 = layer_norm(hidden, ln2_g_ref[0], ln2_b_ref[0])
    h1 = matmul(x2, c_fc_w_ref[0]) + c_fc_b_ref[0]               # [S, I]
    c = 0.7978845608028654  # sqrt(2/pi); hidet ops.gelu(approximate=True)
    h1 = 0.5 * h1 * (1.0 + jnp.tanh(c * (h1 + 0.044715 * h1 * h1 * h1)))
    h2 = matmul(h1, mlp_proj_w_ref[0]) + mlp_proj_b_ref[0]       # [S, H]
    hidden = hidden + h2                                         # residual add

    # In-place KV-cache append: these output blocks are the [P:T] rows of the
    # aliased cache buffers (lane-dense [S, H]).
    new_k_ref[0] = k.astype(new_k_ref.dtype)
    new_v_ref[0] = v.astype(new_v_ref.dtype)

    # Single hidden write per grid step; ln_f selected on the last layer.
    final = layer_norm(hidden, lnf_g_ref[...], lnf_b_ref[...])
    is_last = layer == num_layers - 1
    hidden_ref[...] = jnp.where(is_last, final, hidden).astype(hidden_ref.dtype)


# ----------------------------------------------------------------------------
# Parameters: per-layer tensors stacked along a leading [L] axis; the four big
# matmul weights are stored in bf16 (MXU-native, half the DMA bytes).
# ----------------------------------------------------------------------------
def init_params(key, cfg: GPT2Config):
    H, I, L = cfg.hidden_size, cfg.intermediate_size, cfg.num_hidden_layers
    ks = jax.random.split(key, 6)
    scale = 0.02
    bf16 = jnp.bfloat16
    return {
        "wte": scale * jax.random.normal(ks[0], (cfg.vocab_size, H), jnp.float32),
        "wpe": scale * jax.random.normal(ks[1], (cfg.max_position_embeddings, H),
                                         jnp.float32),
        "ln_f_g": jnp.ones((1, H), jnp.float32),
        "ln_f_b": jnp.zeros((1, H), jnp.float32),
        "ln1_g": jnp.ones((L, 1, H), jnp.float32),
        "ln1_b": jnp.zeros((L, 1, H), jnp.float32),
        "ln2_g": jnp.ones((L, 1, H), jnp.float32),
        "ln2_b": jnp.zeros((L, 1, H), jnp.float32),
        "c_attn_w": (scale * jax.random.normal(ks[2], (L, H, 3 * H), jnp.float32)
                     ).astype(bf16),
        "c_attn_b": jnp.zeros((L, 1, 3 * H), jnp.float32),
        "attn_proj_w": (scale * jax.random.normal(ks[3], (L, H, H), jnp.float32)
                        ).astype(bf16),
        "attn_proj_b": jnp.zeros((L, 1, H), jnp.float32),
        "c_fc_w": (scale * jax.random.normal(ks[4], (L, H, I), jnp.float32)
                   ).astype(bf16),
        "c_fc_b": jnp.zeros((L, 1, I), jnp.float32),
        "mlp_proj_w": (scale * jax.random.normal(ks[5], (L, I, H), jnp.float32)
                       ).astype(bf16),
        "mlp_proj_b": jnp.zeros((L, 1, H), jnp.float32),
    }


# ----------------------------------------------------------------------------
# Model wrapper.  KV cache layout is lane-dense [L, P+S, NH*D]; the caller
# passes the preallocated updated cache with the past in rows [0:past_len];
# the kernel fills rows [past_len:] in place (aliased outputs 1 and 2).
# ----------------------------------------------------------------------------
def gpt2_forward(params, input_ids, position_ids, kv_cache_k, kv_cache_v, *,
                 past_len, cfg: GPT2Config):
    H, NH, D = cfg.hidden_size, cfg.num_heads, cfg.head_dim
    I = cfg.intermediate_size
    L = cfg.num_hidden_layers
    S = int(input_ids.shape[0])
    P = int(past_len)
    T = P + S
    assert kv_cache_k.shape == (L, T, H) and kv_cache_v.shape == (L, T, H)
    # In-place append requires the new rows to start on a write-block boundary.
    # TODO(synk): support arbitrary past_len via element-offset output blocks.
    assert P > 0 and P % S == 0 and S % 8 == 0

    dt = kv_cache_k.dtype

    # Embedding gather stays in XLA (glue).
    emb = (params["wte"][input_ids] + params["wpe"][position_ids]
           ).astype(jnp.float32)                                  # [S, H]

    kernel = functools.partial(_gpt2_fused_kernel, num_heads=NH,
                               head_dim=D, eps=cfg.layer_norm_epsilon)

    def per_layer(shape):
        # Block = one layer slice; leading dim indexed by the layer grid axis.
        return pl.BlockSpec((1,) + tuple(shape[1:]),
                            lambda l, _r=len(shape) - 1: (l,) + (0,) * _r)

    def shared(shape):
        # Constant block index: stays resident in VMEM across the layer grid.
        return pl.BlockSpec(tuple(shape), lambda l, _r=len(shape): (0,) * _r)

    in_specs = [
        shared((S, H)),                                            # emb
        per_layer((L, 1, H)), per_layer((L, 1, H)),                # ln1 g/b
        per_layer((L, H, 3 * H)), per_layer((L, 1, 3 * H)),        # c_attn w/b
        per_layer((L, H, H)), per_layer((L, 1, H)),                # attn proj w/b
        per_layer((L, 1, H)), per_layer((L, 1, H)),                # ln2 g/b
        per_layer((L, H, I)), per_layer((L, 1, I)),                # c_fc w/b
        per_layer((L, I, H)), per_layer((L, 1, H)),                # mlp proj w/b
        shared((1, H)), shared((1, H)),                            # ln_f g/b
        pl.BlockSpec((1, P, H), lambda l: (l, 0, 0)),              # past K rows
        pl.BlockSpec((1, P, H), lambda l: (l, 0, 0)),              # past V rows
    ]
    out_specs = (
        shared((S, H)),                                  # hidden (VMEM carry)
        pl.BlockSpec((1, S, H), lambda l: (l, P // S, 0)),  # K rows [P:T]
        pl.BlockSpec((1, S, H), lambda l: (l, P // S, 0)),  # V rows [P:T]
    )
    out_shape = (
        jax.ShapeDtypeStruct((S, H), jnp.float32),
        jax.ShapeDtypeStruct((L, T, H), dt),
        jax.ShapeDtypeStruct((L, T, H), dt),
    )
    scratch_shapes = [
        pltpu.VMEM((T, H), jnp.float32),   # K slab (past + new)
        pltpu.VMEM((T, H), jnp.float32),   # V slab
        pltpu.VMEM((S, H), jnp.float32),   # per-head attention output buffer
    ]

    hidden_out, upd_k, upd_v = pl.pallas_call(
        kernel,
        out_shape=out_shape,
        grid=(L,),
        in_specs=in_specs,
        out_specs=out_specs,
        scratch_shapes=scratch_shapes,
        # KV-cache inputs (operands 15/16) alias outputs 1/2: unwritten rows
        # [0:P] keep the donated past data -> true in-place append.
        input_output_aliases={15: 1, 16: 2},
        compiler_params=pltpu.CompilerParams(
            dimension_semantics=("arbitrary",),            # layers sequential
            vmem_limit_bytes=64 * 1024 * 1024),            # keep weight blocks
    )(emb,                                                 # double-buffered
      params["ln1_g"], params["ln1_b"],
      params["c_attn_w"], params["c_attn_b"],
      params["attn_proj_w"], params["attn_proj_b"],
      params["ln2_g"], params["ln2_b"],
      params["c_fc_w"], params["c_fc_b"],
      params["mlp_proj_w"], params["mlp_proj_b"],
      params["ln_f_g"], params["ln_f_b"],
      kv_cache_k, kv_cache_v)

    new_position_ids = position_ids[-1:] + 1
    return hidden_out, new_position_ids, upd_k, upd_v


# ----------------------------------------------------------------------------
# Pure-JAX reference (f32), same lane-dense KV layout, for a sanity check.
# ----------------------------------------------------------------------------
def reference_forward(params, input_ids, position_ids, past_k, past_v,
                      cfg: GPT2Config):
    H, NH, D = cfg.hidden_size, cfg.num_heads, cfg.head_dim
    S = input_ids.shape[0]
    P = past_k.shape[1]
    T = P + S
    eps = cfg.layer_norm_epsilon
    f32 = jnp.float32

    def ln(x, g, b):
        m = jnp.mean(x, -1, keepdims=True)
        c = x - m
        v = jnp.mean(c * c, -1, keepdims=True)
        return c * jax.lax.rsqrt(v + eps) * g + b

    hidden = params["wte"][input_ids] + params["wpe"][position_ids]
    i = jnp.arange(S)[:, None]
    j = jnp.arange(T)[None, :]
    mask = jnp.where(j <= i + P, 0.0, -1e30).astype(f32)
    new_ks, new_vs = [], []
    for l in range(cfg.num_hidden_layers):
        res = hidden
        x = ln(hidden, params["ln1_g"][l], params["ln1_b"][l])
        qkv = x @ params["c_attn_w"][l].astype(f32) + params["c_attn_b"][l]
        q, k, v = jnp.split(qkv, 3, -1)
        kk = jnp.concatenate([past_k[l], k], axis=0)              # [T, H]
        vv = jnp.concatenate([past_v[l], v], axis=0)
        qh = q.reshape(S, NH, D).transpose(1, 0, 2)
        kh = kk.reshape(T, NH, D).transpose(1, 0, 2)
        vh = vv.reshape(T, NH, D).transpose(1, 0, 2)
        s = jnp.einsum('hqd,hkd->hqk', qh, kh) / math.sqrt(D) + mask
        p = jax.nn.softmax(s, -1)
        o = jnp.einsum('hqk,hkd->hqd', p, vh).transpose(1, 0, 2).reshape(S, H)
        hidden = o @ params["attn_proj_w"][l].astype(f32) \
            + params["attn_proj_b"][l] + res
        res = hidden
        x = ln(hidden, params["ln2_g"][l], params["ln2_b"][l])
        h1 = x @ params["c_fc_w"][l].astype(f32) + params["c_fc_b"][l]
        c = 0.7978845608028654
        h1 = 0.5 * h1 * (1.0 + jnp.tanh(c * (h1 + 0.044715 * h1 * h1 * h1)))
        hidden = h1 @ params["mlp_proj_w"][l].astype(f32) \
            + params["mlp_proj_b"][l] + res
        new_ks.append(k[None])
        new_vs.append(v[None])
    hidden = ln(hidden, params["ln_f_g"], params["ln_f_b"])
    upd_k = jnp.concatenate([past_k, jnp.concatenate(new_ks, 0)], axis=1)
    upd_v = jnp.concatenate([past_v, jnp.concatenate(new_vs, 0)], axis=1)
    return hidden, position_ids[-1:] + 1, upd_k, upd_v


# ----------------------------------------------------------------------------
# Main
# ----------------------------------------------------------------------------
if __name__ == "__main__":
    cfg = GPT2Config(vocab_size=256, max_position_embeddings=64, hidden_size=32,
                     num_hidden_layers=2, intermediate_size=128,
                     layer_norm_epsilon=1e-5, num_heads=4)

    root = jax.random.PRNGKey(0)
    k_params, k_ids, k_pk, k_pv = jax.random.split(root, 4)
    params = init_params(k_params, cfg)

    seq_len = 8
    prev_len = 8
    total_len = prev_len + seq_len
    H = cfg.hidden_size
    L = cfg.num_hidden_layers

    input_ids = jax.random.randint(k_ids, (seq_len,), 0, cfg.vocab_size,
                                   dtype=jnp.int32)
    position_ids = jnp.arange(prev_len, prev_len + seq_len, dtype=jnp.int32)

    # Lane-dense past KV cache: [L, P, NH*D] (heads folded into the lane axis).
    past_keys = 0.02 * jax.random.normal(k_pk, (L, prev_len, H), jnp.float32)
    past_values = 0.02 * jax.random.normal(k_pv, (L, prev_len, H), jnp.float32)

    # Preallocated updated cache [L, P+S, H]: past in rows [0:P], new rows are
    # appended IN PLACE by the kernel (aliased + donated).  In a real decode
    # loop this buffer is allocated once at max length and re-donated each
    # step, so the past is never copied.
    kv_cache_k = jnp.zeros((L, total_len, H), jnp.float32
                           ).at[:, :prev_len, :].set(past_keys)
    kv_cache_v = jnp.zeros((L, total_len, H), jnp.float32
                           ).at[:, :prev_len, :].set(past_values)

    fwd = jax.jit(functools.partial(gpt2_forward, past_len=prev_len, cfg=cfg),
                  donate_argnums=(3, 4))
    hidden, new_pos, upd_keys, upd_values = fwd(
        params, input_ids, position_ids, kv_cache_k, kv_cache_v)
    jax.block_until_ready((hidden, new_pos, upd_keys, upd_values))

    assert hidden.shape == (seq_len, H)
    assert new_pos.shape == (1,)
    assert upd_keys.shape == (L, total_len, H)
    assert upd_values.shape == upd_keys.shape

    # Sanity-check against the f32 pure-JAX reference (loose tolerance: the
    # kernel feeds bf16 operands to the MXU and uses the approx EUP reciprocal
    # in the softmax, accumulation stays f32).
    r_hidden, r_pos, r_keys, r_values = jax.jit(
        functools.partial(reference_forward, cfg=cfg))(
        params, input_ids, position_ids, past_keys, past_values)

    tol = dict(rtol=5e-2, atol=5e-2)
    assert bool(jnp.allclose(hidden, r_hidden, **tol))
    assert bool(jnp.allclose(upd_keys, r_keys, **tol))
    assert bool(jnp.allclose(upd_values, r_values, **tol))
    assert bool(jnp.all(new_pos == r_pos))

    print("KERNEL_OK")
</pallas_src>

<mosaic_0001>
module attributes {stable_mosaic.version = 11 : i64} {
  func.func @_gpt2_fused_kernel(%arg0: i32, %arg1: memref<8x32xf32, #tpu.memory_space<vmem>>, %arg2: memref<1x1x32xf32, #tpu.memory_space<vmem>>, %arg3: memref<1x1x32xf32, #tpu.memory_space<vmem>>, %arg4: memref<1x32x96xbf16, #tpu.memory_space<vmem>>, %arg5: memref<1x1x96xf32, #tpu.memory_space<vmem>>, %arg6: memref<1x32x32xbf16, #tpu.memory_space<vmem>>, %arg7: memref<1x1x32xf32, #tpu.memory_space<vmem>>, %arg8: memref<1x1x32xf32, #tpu.memory_space<vmem>>, %arg9: memref<1x1x32xf32, #tpu.memory_space<vmem>>, %arg10: memref<1x32x128xbf16, #tpu.memory_space<vmem>>, %arg11: memref<1x1x128xf32, #tpu.memory_space<vmem>>, %arg12: memref<1x128x32xbf16, #tpu.memory_space<vmem>>, %arg13: memref<1x1x32xf32, #tpu.memory_space<vmem>>, %arg14: memref<1x32xf32, #tpu.memory_space<vmem>>, %arg15: memref<1x32xf32, #tpu.memory_space<vmem>>, %arg16: memref<1x8x32xf32, #tpu.memory_space<vmem>>, %arg17: memref<1x8x32xf32, #tpu.memory_space<vmem>>, %arg18: memref<8x32xf32, #tpu.memory_space<vmem>>, %arg19: memref<1x8x32xf32, #tpu.memory_space<vmem>>, %arg20: memref<1x8x32xf32, #tpu.memory_space<vmem>>, %arg21: memref<16x32xf32, #tpu.memory_space<vmem>>, %arg22: memref<16x32xf32, #tpu.memory_space<vmem>>, %arg23: memref<8x32xf32, #tpu.memory_space<vmem>>) attributes {dimension_semantics = [#tpu.dimension_semantics<arbitrary>], iteration_bounds = array<i64: 2>, scalar_prefetch = 0 : i64, scratch_operands = 3 : i64, tpu.core_type = #tpu.core_type<tc>, window_params = [{pipeline_mode = #tpu.pipeline_mode<synchronous>, transform_indices = @transform_0, window_bounds = array<i64: 8, 32>}, {transform_indices = @transform_1, window_bounds = array<i64: 1, 1, 32>}, {transform_indices = @transform_2, window_bounds = array<i64: 1, 1, 32>}, {transform_indices = @transform_3, window_bounds = array<i64: 1, 32, 96>}, {transform_indices = @transform_4, window_bounds = array<i64: 1, 1, 96>}, {transform_indices = @transform_5, window_bounds = array<i64: 1, 32, 32>}, {transform_indices = @transform_6, window_bounds = array<i64: 1, 1, 32>}, {transform_indices = @transform_7, window_bounds = array<i64: 1, 1, 32>}, {transform_indices = @transform_8, window_bounds = array<i64: 1, 1, 32>}, {transform_indices = @transform_9, window_bounds = array<i64: 1, 32, 128>}, {transform_indices = @transform_10, window_bounds = array<i64: 1, 1, 128>}, {transform_indices = @transform_11, window_bounds = array<i64: 1, 128, 32>}, {transform_indices = @transform_12, window_bounds = array<i64: 1, 1, 32>}, {pipeline_mode = #tpu.pipeline_mode<synchronous>, transform_indices = @transform_13, window_bounds = array<i64: 1, 32>}, {pipeline_mode = #tpu.pipeline_mode<synchronous>, transform_indices = @transform_14, window_bounds = array<i64: 1, 32>}, {transform_indices = @transform_15, window_bounds = array<i64: 1, 8, 32>}, {transform_indices = @transform_16, window_bounds = array<i64: 1, 8, 32>}, {pipeline_mode = #tpu.pipeline_mode<synchronous>, transform_indices = @transform_17, window_bounds = array<i64: 8, 32>}, {transform_indices = @transform_18, window_bounds = array<i64: 1, 8, 32>}, {transform_indices = @transform_19, window_bounds = array<i64: 1, 8, 32>}]} {
    %c0_i32 = arith.constant 0 : i32
    %0 = arith.cmpi eq, %arg0, %c0_i32 : i32
    %1 = arith.extui %0 : i1 to i32
    %c0_i32_0 = arith.constant 0 : i32
    %2 = arith.cmpi ne, %1, %c0_i32_0 : i32
    scf.if %2 {
      %c0_133 = arith.constant 0 : index
      %c0_134 = arith.constant 0 : index
      %243 = vector.load %arg1[%c0_133, %c0_134] : memref<8x32xf32, #tpu.memory_space<vmem>>, vector<8x32xf32>
      %c0_135 = arith.constant 0 : index
      %c0_136 = arith.constant 0 : index
      %244 = vector.load %arg18[%c0_135, %c0_136] : memref<8x32xf32, #tpu.memory_space<vmem>>, vector<8x32xf32>
      tpu.vector_store %arg18[%c0_135, %c0_136], %243 {strides = array<i32>} : memref<8x32xf32, #tpu.memory_space<vmem>>, vector<8x32xf32>,
    } else {
    }
    %c0 = arith.constant 0 : index
    %c0_1 = arith.constant 0 : index
    %3 = vector.load %arg18[%c0, %c0_1] : memref<8x32xf32, #tpu.memory_space<vmem>>, vector<8x32xf32>
    %c0_2 = arith.constant 0 : index
    %c0_3 = arith.constant 0 : index
    %c0_4 = arith.constant 0 : index
    %4 = vector.load %arg2[%c0_2, %c0_3, %c0_4] : memref<1x1x32xf32, #tpu.memory_space<vmem>>, vector<1x1x32xf32>
    %5 = vector.shape_cast %4 : vector<1x1x32xf32> to vector<1x32xf32>
    %c0_5 = arith.constant 0 : index
    %c0_6 = arith.constant 0 : index
    %c0_7 = arith.constant 0 : index
    %6 = vector.load %arg3[%c0_5, %c0_6, %c0_7] : memref<1x1x32xf32, #tpu.memory_space<vmem>>, vector<1x1x32xf32>
    %7 = vector.shape_cast %6 : vector<1x1x32xf32> to vector<1x32xf32>
    %cst = arith.constant dense<0.000000e+00> : vector<8xf32>
    %8 = vector.multi_reduction <add>, %3, %cst [1] : vector<8x32xf32> to vector<8xf32>
    %9 = vector.shape_cast %8 : vector<8xf32> to vector<8x1xf32>
    %cst_8 = arith.constant 3.200000e+01 : f32
    %10 = vector.broadcast %cst_8 : f32 to vector<8x1xf32>
    %11 = arith.divf %9, %10 : vector<8x1xf32>
    %12 = vector.broadcast %11 : vector<8x1xf32> to vector<8x32xf32>
    %13 = arith.subf %3, %12 : vector<8x32xf32>
    %14 = arith.mulf %13, %13 : vector<8x32xf32>
    %cst_9 = arith.constant dense<0.000000e+00> : vector<8xf32>
    %15 = vector.multi_reduction <add>, %14, %cst_9 [1] : vector<8x32xf32> to vector<8xf32>
    %16 = vector.shape_cast %15 : vector<8xf32> to vector<8x1xf32>
    %cst_10 = arith.constant 3.200000e+01 : f32
    %17 = vector.broadcast %cst_10 : f32 to vector<8x1xf32>
    %18 = arith.divf %16, %17 : vector<8x1xf32>
    %cst_11 = arith.constant 9.99999974E-6 : f32
    %19 = vector.broadcast %cst_11 : f32 to vector<8x1xf32>
    %20 = arith.addf %18, %19 : vector<8x1xf32>
    %21 = math.rsqrt %20 : vector<8x1xf32>
    %22 = vector.broadcast %21 : vector<8x1xf32> to vector<8x32xf32>
    %23 = arith.mulf %13, %22 : vector<8x32xf32>
    %24 = vector.broadcast %5 : vector<1x32xf32> to vector<8x32xf32>
    %25 = arith.mulf %23, %24 : vector<8x32xf32>
    %26 = vector.broadcast %7 : vector<1x32xf32> to vector<8x32xf32>
    %27 = arith.addf %25, %26 : vector<8x32xf32>
    %c0_12 = arith.constant 0 : index
    %c0_13 = arith.constant 0 : index
    %c0_14 = arith.constant 0 : index
    %28 = vector.load %arg4[%c0_12, %c0_13, %c0_14] : memref<1x32x96xbf16, #tpu.memory_space<vmem>>, vector<1x32x96xbf16>
    %29 = vector.shape_cast %28 : vector<1x32x96xbf16> to vector<32x96xbf16>
    %30 = arith.truncf %27 : vector<8x32xf32> to vector<8x32xbf16>
    %cst_15 = arith.constant dense<0.000000e+00> : vector<8x96xf32>
    %31 = tpu.matmul %30, %29, %cst_15 {dimension_numbers = #tpu.dot_dimension_numbers<[1], [0], [0], [1], [0, 0, 1, 1], [], []>} : vector<8x32xbf16>, vector<32x96xbf16>, vector<8x96xf32> -> vector<8x96xf32>
    %c0_16 = arith.constant 0 : index
    %c0_17 = arith.constant 0 : index
    %c0_18 = arith.constant 0 : index
    %32 = vector.load %arg5[%c0_16, %c0_17, %c0_18] : memref<1x1x96xf32, #tpu.memory_space<vmem>>, vector<1x1x96xf32>
    %33 = vector.shape_cast %32 : vector<1x1x96xf32> to vector<1x96xf32>
    %34 = vector.broadcast %33 : vector<1x96xf32> to vector<8x96xf32>
    %35 = arith.addf %31, %34 : vector<8x96xf32>
    %36 = vector.extract_strided_slice %35 {offsets = [0, 0], sizes = [8, 32], strides = [1, 1]} : vector<8x96xf32> to vector<8x32xf32>
    %37 = vector.extract_strided_slice %35 {offsets = [0, 32], sizes = [8, 32], strides = [1, 1]} : vector<8x96xf32> to vector<8x32xf32>
    %38 = vector.extract_strided_slice %35 {offsets = [0, 64], sizes = [8, 32], strides = [1, 1]} : vector<8x96xf32> to vector<8x32xf32>
    %c0_19 = arith.constant 0 : index
    %c0_20 = arith.constant 0 : index
    %c0_21 = arith.constant 0 : index
    %39 = vector.load %arg16[%c0_19, %c0_20, %c0_21] : memref<1x8x32xf32, #tpu.memory_space<vmem>>, vector<1x8x32xf32>
    %40 = vector.shape_cast %39 : vector<1x8x32xf32> to vector<8x32xf32>
    %c0_22 = arith.constant 0 : index
    %c0_23 = arith.constant 0 : index
    %41 = vector.load %arg21[%c0_22, %c0_23] : memref<16x32xf32, #tpu.memory_space<vmem>>, vector<8x32xf32>
    tpu.vector_store %arg21[%c0_22, %c0_23], %40 {strides = array<i32>} : memref<16x32xf32, #tpu.memory_space<vmem>>, vector<8x32xf32>,
    %c8 = arith.constant 8 : index
    %c0_24 = arith.constant 0 : index
    %42 = vector.load %arg21[%c8, %c0_24] : memref<16x32xf32, #tpu.memory_space<vmem>>, vector<8x32xf32>
    tpu.vector_store %arg21[%c8, %c0_24], %37 {strides = array<i32>} : memref<16x32xf32, #tpu.memory_space<vmem>>, vector<8x32xf32>,
    %c0_25 = arith.constant 0 : index
    %c0_26 = arith.constant 0 : index
    %c0_27 = arith.constant 0 : index
    %43 = vector.load %arg17[%c0_25, %c0_26, %c0_27] : memref<1x8x32xf32, #tpu.memory_space<vmem>>, vector<1x8x32xf32>
    %44 = vector.shape_cast %43 : vector<1x8x32xf32> to vector<8x32xf32>
    %c0_28 = arith.constant 0 : index
    %c0_29 = arith.constant 0 : index
    %45 = vector.load %arg22[%c0_28, %c0_29] : memref<16x32xf32, #tpu.memory_space<vmem>>, vector<8x32xf32>
    tpu.vector_store %arg22[%c0_28, %c0_29], %44 {strides = array<i32>} : memref<16x32xf32, #tpu.memory_space<vmem>>, vector<8x32xf32>,
    %c8_30 = arith.constant 8 : index
    %c0_31 = arith.constant 0 : index
    %46 = vector.load %arg22[%c8_30, %c0_31] : memref<16x32xf32, #tpu.memory_space<vmem>>, vector<8x32xf32>
    tpu.vector_store %arg22[%c8_30, %c0_31], %38 {strides = array<i32>} : memref<16x32xf32, #tpu.memory_space<vmem>>, vector<8x32xf32>,
    %47 = tpu.iota {dimensions = array<i32: 0>} : vector<8x16xi32>
    %48 = tpu.iota {dimensions = array<i32: 1>} : vector<8x16xi32>
    %c8_i32 = arith.constant 8 : i32
    %49 = vector.broadcast %c8_i32 : i32 to vector<8x16xi32>
    %50 = arith.addi %47, %49 : vector<8x16xi32>
    %51 = arith.cmpi sle, %48, %50 : vector<8x16xi32>
    %52 = vector.extract_strided_slice %36 {offsets = [0, 0], sizes = [8, 8], strides = [1, 1]} : vector<8x32xf32> to vector<8x8xf32>
    %c0_32 = arith.constant 0 : index
    %c0_33 = arith.constant 0 : index
    %53 = vector.load %arg21[%c0_32, %c0_33] : memref<16x32xf32, #tpu.memory_space<vmem>>, vector<16x8xf32>
    %c0_34 = arith.constant 0 : index
    %c0_35 = arith.constant 0 : index
    %54 = vector.load %arg22[%c0_34, %c0_35] : memref<16x32xf32, #tpu.memory_space<vmem>>, vector<16x8xf32>
    %55 = arith.truncf %52 : vector<8x8xf32> to vector<8x8xbf16>
    %56 = arith.truncf %53 : vector<16x8xf32> to vector<16x8xbf16>
    %cst_36 = arith.constant dense<0.000000e+00> : vector<8x16xf32>
    %57 = tpu.matmul %55, %56, %cst_36 {dimension_numbers = #tpu.dot_dimension_numbers<[1], [1], [0], [0], [0, 0, 1, 0], [], []>} : vector<8x8xbf16>, vector<16x8xbf16>, vector<8x16xf32> -> vector<8x16xf32>
    %cst_37 = arith.constant 0.353553385 : f32
    %58 = vector.broadcast %cst_37 : f32 to vector<8x16xf32>
    %59 = arith.mulf %57, %58 : vector<8x16xf32>
    %cst_38 = arith.constant -1.000000e+30 : f32
    %60 = vector.broadcast %cst_38 : f32 to vector<8x16xf32>
    %61 = arith.select %51, %59, %60 : vector<8x16xi1>, vector<8x16xf32>
    %cst_39 = arith.constant dense<0xFF800000> : vector<8xf32>
    %62 = vector.multi_reduction <maximumf>, %61, %cst_39 [1] : vector<8x16xf32> to vector<8xf32>
    %63 = vector.shape_cast %62 : vector<8xf32> to vector<8x1xf32>
    %64 = vector.broadcast %63 : vector<8x1xf32> to vector<8x16xf32>
    %65 = arith.subf %61, %64 : vector<8x16xf32>
    %66 = math.exp %65 : vector<8x16xf32>
    %cst_40 = arith.constant dense<0.000000e+00> : vector<8xf32>
    %67 = vector.multi_reduction <add>, %66, %cst_40 [1] : vector<8x16xf32> to vector<8xf32>
    %68 = vector.shape_cast %67 : vector<8xf32> to vector<8x1xf32>
    %69 = tpu.reciprocal %68 {approx = true} : vector<8x1xf32> -> vector<8x1xf32>
    %70 = vector.broadcast %69 : vector<8x1xf32> to vector<8x16xf32>
    %71 = arith.mulf %66, %70 : vector<8x16xf32>
    %72 = arith.truncf %71 : vector<8x16xf32> to vector<8x16xbf16>
    %73 = arith.truncf %54 : vector<16x8xf32> to vector<16x8xbf16>
    %cst_41 = arith.constant dense<0.000000e+00> : vector<8x8xf32>
    %74 = tpu.matmul %72, %73, %cst_41 {dimension_numbers = #tpu.dot_dimension_numbers<[1], [0], [0], [1], [0, 0, 1, 1], [], []>} : vector<8x16xbf16>, vector<16x8xbf16>, vector<8x8xf32> -> vector<8x8xf32>
    %c0_42 = arith.constant 0 : index
    %c0_43 = arith.constant 0 : index
    %75 = vector.load %arg23[%c0_42, %c0_43] : memref<8x32xf32, #tpu.memory_space<vmem>>, vector<8x8xf32>
    tpu.vector_store %arg23[%c0_42, %c0_43], %74 {strides = array<i32>} : memref<8x32xf32, #tpu.memory_space<vmem>>, vector<8x8xf32>,
    %76 = vector.extract_strided_slice %36 {offsets = [0, 8], sizes = [8, 8], strides = [1, 1]} : vector<8x32xf32> to vector<8x8xf32>
    %c0_44 = arith.constant 0 : index
    %c8_45 = arith.constant 8 : index
    %77 = vector.load %arg21[%c0_44, %c8_45] : memref<16x32xf32, #tpu.memory_space<vmem>>, vector<16x8xf32>
    %c0_46 = arith.constant 0 : index
    %c8_47 = arith.constant 8 : index
    %78 = vector.load %arg22[%c0_46, %c8_47] : memref<16x32xf32, #tpu.memory_space<vmem>>, vector<16x8xf32>
    %79 = arith.truncf %76 : vector<8x8xf32> to vector<8x8xbf16>
    %80 = arith.truncf %77 : vector<16x8xf32> to vector<16x8xbf16>
    %cst_48 = arith.constant dense<0.000000e+00> : vector<8x16xf32>
    %81 = tpu.matmul %79, %80, %cst_48 {dimension_numbers = #tpu.dot_dimension_numbers<[1], [1], [0], [0], [0, 0, 1, 0], [], []>} : vector<8x8xbf16>, vector<16x8xbf16>, vector<8x16xf32> -> vector<8x16xf32>
    %cst_49 = arith.constant 0.353553385 : f32
    %82 = vector.broadcast %cst_49 : f32 to vector<8x16xf32>
    %83 = arith.mulf %81, %82 : vector<8x16xf32>
    %cst_50 = arith.constant -1.000000e+30 : f32
    %84 = vector.broadcast %cst_50 : f32 to vector<8x16xf32>
    %85 = arith.select %51, %83, %84 : vector<8x16xi1>, vector<8x16xf32>
    %cst_51 = arith.constant dense<0xFF800000> : vector<8xf32>
    %86 = vector.multi_reduction <maximumf>, %85, %cst_51 [1] : vector<8x16xf32> to vector<8xf32>
    %87 = vector.shape_cast %86 : vector<8xf32> to vector<8x1xf32>
    %88 = vector.broadcast %87 : vector<8x1xf32> to vector<8x16xf32>
    %89 = arith.subf %85, %88 : vector<8x16xf32>
    %90 = math.exp %89 : vector<8x16xf32>
    %cst_52 = arith.constant dense<0.000000e+00> : vector<8xf32>
    %91 = vector.multi_reduction <add>, %90, %cst_52 [1] : vector<8x16xf32> to vector<8xf32>
    %92 = vector.shape_cast %91 : vector<8xf32> to vector<8x1xf32>
    %93 = tpu.reciprocal %92 {approx = true} : vector<8x1xf32> -> vector<8x1xf32>
    %94 = vector.broadcast %93 : vector<8x1xf32> to vector<8x16xf32>
    %95 = arith.mulf %90, %94 : vector<8x16xf32>
    %96 = arith.truncf %95 : vector<8x16xf32> to vector<8x16xbf16>
    %97 = arith.truncf %78 : vector<16x8xf32> to vector<16x8xbf16>
    %cst_53 = arith.constant dense<0.000000e+00> : vector<8x8xf32>
    %98 = tpu.matmul %96, %97, %cst_53 {dimension_numbers = #tpu.dot_dimension_numbers<[1], [0], [0], [1], [0, 0, 1, 1], [], []>} : vector<8x16xbf16>, vector<16x8xbf16>, vector<8x8xf32> -> vector<8x8xf32>
    %c0_54 = arith.constant 0 : index
    %c8_55 = arith.constant 8 : index
    %99 = vector.load %arg23[%c0_54, %c8_55] : memref<8x32xf32, #tpu.memory_space<vmem>>, vector<8x8xf32>
    tpu.vector_store %arg23[%c0_54, %c8_55], %98 {strides = array<i32>} : memref<8x32xf32, #tpu.memory_space<vmem>>, vector<8x8xf32>,
    %100 = vector.extract_strided_slice %36 {offsets = [0, 16], sizes = [8, 8], strides = [1, 1]} : vector<8x32xf32> to vector<8x8xf32>
    %c0_56 = arith.constant 0 : index
    %c16 = arith.constant 16 : index
    %101 = vector.load %arg21[%c0_56, %c16] : memref<16x32xf32, #tpu.memory_space<vmem>>, vector<16x8xf32>
    %c0_57 = arith.constant 0 : index
    %c16_58 = arith.constant 16 : index
    %102 = vector.load %arg22[%c0_57, %c16_58] : memref<16x32xf32, #tpu.memory_space<vmem>>, vector<16x8xf32>
    %103 = arith.truncf %100 : vector<8x8xf32> to vector<8x8xbf16>
    %104 = arith.truncf %101 : vector<16x8xf32> to vector<16x8xbf16>
    %cst_59 = arith.constant dense<0.000000e+00> : vector<8x16xf32>
    %105 = tpu.matmul %103, %104, %cst_59 {dimension_numbers = #tpu.dot_dimension_numbers<[1], [1], [0], [0], [0, 0, 1, 0], [], []>} : vector<8x8xbf16>, vector<16x8xbf16>, vector<8x16xf32> -> vector<8x16xf32>
    %cst_60 = arith.constant 0.353553385 : f32
    %106 = vector.broadcast %cst_60 : f32 to vector<8x16xf32>
    %107 = arith.mulf %105, %106 : vector<8x16xf32>
    %cst_61 = arith.constant -1.000000e+30 : f32
    %108 = vector.broadcast %cst_61 : f32 to vector<8x16xf32>
    %109 = arith.select %51, %107, %108 : vector<8x16xi1>, vector<8x16xf32>
    %cst_62 = arith.constant dense<0xFF800000> : vector<8xf32>
    %110 = vector.multi_reduction <maximumf>, %109, %cst_62 [1] : vector<8x16xf32> to vector<8xf32>
    %111 = vector.shape_cast %110 : vector<8xf32> to vector<8x1xf32>
    %112 = vector.broadcast %111 : vector<8x1xf32> to vector<8x16xf32>
    %113 = arith.subf %109, %112 : vector<8x16xf32>
    %114 = math.exp %113 : vector<8x16xf32>
    %cst_63 = arith.constant dense<0.000000e+00> : vector<8xf32>
    %115 = vector.multi_reduction <add>, %114, %cst_63 [1] : vector<8x16xf32> to vector<8xf32>
    %116 = vector.shape_cast %115 : vector<8xf32> to vector<8x1xf32>
    %117 = tpu.reciprocal %116 {approx = true} : vector<8x1xf32> -> vector<8x1xf32>
    %118 = vector.broadcast %117 : vector<8x1xf32> to vector<8x16xf32>
    %119 = arith.mulf %114, %118 : vector<8x16xf32>
    %120 = arith.truncf %119 : vector<8x16xf32> to vector<8x16xbf16>
    %121 = arith.truncf %102 : vector<16x8xf32> to vector<16x8xbf16>
    %cst_64 = arith.constant dense<0.000000e+00> : vector<8x8xf32>
    %122 = tpu.matmul %120, %121, %cst_64 {dimension_numbers = #tpu.dot_dimension_numbers<[1], [0], [0], [1], [0, 0, 1, 1], [], []>} : vector<8x16xbf16>, vector<16x8xbf16>, vector<8x8xf32> -> vector<8x8xf32>
    %c0_65 = arith.constant 0 : index
    %c16_66 = arith.constant 16 : index
    %123 = vector.load %arg23[%c0_65, %c16_66] : memref<8x32xf32, #tpu.memory_space<vmem>>, vector<8x8xf32>
    tpu.vector_store %arg23[%c0_65, %c16_66], %122 {strides = array<i32>} : memref<8x32xf32, #tpu.memory_space<vmem>>, vector<8x8xf32>,
    %124 = vector.extract_strided_slice %36 {offsets = [0, 24], sizes = [8, 8], strides = [1, 1]} : vector<8x32xf32> to vector<8x8xf32>
    %c0_67 = arith.constant 0 : index
    %c24 = arith.constant 24 : index
    %125 = vector.load %arg21[%c0_67, %c24] : memref<16x32xf32, #tpu.memory_space<vmem>>, vector<16x8xf32>
    %c0_68 = arith.constant 0 : index
    %c24_69 = arith.constant 24 : index
    %126 = vector.load %arg22[%c0_68, %c24_69] : memref<16x32xf32, #tpu.memory_space<vmem>>, vector<16x8xf32>
    %127 = arith.truncf %124 : vector<8x8xf32> to vector<8x8xbf16>
    %128 = arith.truncf %125 : vector<16x8xf32> to vector<16x8xbf16>
    %cst_70 = arith.constant dense<0.000000e+00> : vector<8x16xf32>
    %129 = tpu.matmul %127, %128, %cst_70 {dimension_numbers = #tpu.dot_dimension_numbers<[1], [1], [0], [0], [0, 0, 1, 0], [], []>} : vector<8x8xbf16>, vector<16x8xbf16>, vector<8x16xf32> -> vector<8x16xf32>
    %cst_71 = arith.constant 0.353553385 : f32
    %130 = vector.broadcast %cst_71 : f32 to vector<8x16xf32>
    %131 = arith.mulf %129, %130 : vector<8x16xf32>
    %cst_72 = arith.constant -1.000000e+30 : f32
    %132 = vector.broadcast %cst_72 : f32 to vector<8x16xf32>
    %133 = arith.select %51, %131, %132 : vector<8x16xi1>, vector<8x16xf32>
    %cst_73 = arith.constant dense<0xFF800000> : vector<8xf32>
    %134 = vector.multi_reduction <maximumf>, %133, %cst_73 [1] : vector<8x16xf32> to vector<8xf32>
    %135 = vector.shape_cast %134 : vector<8xf32> to vector<8x1xf32>
    %136 = vector.broadcast %135 : vector<8x1xf32> to vector<8x16xf32>
    %137 = arith.subf %133, %136 : vector<8x16xf32>
    %138 = math.exp %137 : vector<8x16xf32>
    %cst_74 = arith.constant dense<0.000000e+00> : vector<8xf32>
    %139 = vector.multi_reduction <add>, %138, %cst_74 [1] : vector<8x16xf32> to vector<8xf32>
    %140 = vector.shape_cast %139 : vector<8xf32> to vector<8x1xf32>
    %141 = tpu.reciprocal %140 {approx = true} : vector<8x1xf32> -> vector<8x1xf32>
    %142 = vector.broadcast %141 : vector<8x1xf32> to vector<8x16xf32>
    %143 = arith.mulf %138, %142 : vector<8x16xf32>
    %144 = arith.truncf %143 : vector<8x16xf32> to vector<8x16xbf16>
    %145 = arith.truncf %126 : vector<16x8xf32> to vector<16x8xbf16>
    %cst_75 = arith.constant dense<0.000000e+00> : vector<8x8xf32>
    %146 = tpu.matmul %144, %145, %cst_75 {dimension_numbers = #tpu.dot_dimension_numbers<[1], [0], [0], [1], [0, 0, 1, 1], [], []>} : vector<8x16xbf16>, vector<16x8xbf16>, vector<8x8xf32> -> vector<8x8xf32>
    %c0_76 = arith.constant 0 : index
    %c24_77 = arith.constant 24 : index
    %147 = vector.load %arg23[%c0_76, %c24_77] : memref<8x32xf32, #tpu.memory_space<vmem>>, vector<8x8xf32>
    tpu.vector_store %arg23[%c0_76, %c24_77], %146 {strides = array<i32>} : memref<8x32xf32, #tpu.memory_space<vmem>>, vector<8x8xf32>,
    %c0_78 = arith.constant 0 : index
    %c0_79 = arith.constant 0 : index
    %148 = vector.load %arg23[%c0_78, %c0_79] : memref<8x32xf32, #tpu.memory_space<vmem>>, vector<8x32xf32>
    %c0_80 = arith.constant 0 : index
    %c0_81 = arith.constant 0 : index
    %c0_82 = arith.constant 0 : index
    %149 = vector.load %arg6[%c0_80, %c0_81, %c0_82] : memref<1x32x32xbf16, #tpu.memory_space<vmem>>, vector<1x32x32xbf16>
    %150 = vector.shape_cast %149 : vector<1x32x32xbf16> to vector<32x32xbf16>
    %151 = arith.truncf %148 : vector<8x32xf32> to vector<8x32xbf16>
    %cst_83 = arith.constant dense<0.000000e+00> : vector<8x32xf32>
    %152 = tpu.matmul %151, %150, %cst_83 {dimension_numbers = #tpu.dot_dimension_numbers<[1], [0], [0], [1], [0, 0, 1, 1], [], []>} : vector<8x32xbf16>, vector<32x32xbf16>, vector<8x32xf32> -> vector<8x32xf32>
    %c0_84 = arith.constant 0 : index
    %c0_85 = arith.constant 0 : index
    %c0_86 = arith.constant 0 : index
    %153 = vector.load %arg7[%c0_84, %c0_85, %c0_86] : memref<1x1x32xf32, #tpu.memory_space<vmem>>, vector<1x1x32xf32>
    %154 = vector.shape_cast %153 : vector<1x1x32xf32> to vector<1x32xf32>
    %155 = vector.broadcast %154 : vector<1x32xf32> to vector<8x32xf32>
    %156 = arith.addf %152, %155 : vector<8x32xf32>
    %157 = arith.addf %3, %156 : vector<8x32xf32>
    %c0_87 = arith.constant 0 : index
    %c0_88 = arith.constant 0 : index
    %c0_89 = arith.constant 0 : index
    %158 = vector.load %arg8[%c0_87, %c0_88, %c0_89] : memref<1x1x32xf32, #tpu.memory_space<vmem>>, vector<1x1x32xf32>
    %159 = vector.shape_cast %158 : vector<1x1x32xf32> to vector<1x32xf32>
    %c0_90 = arith.constant 0 : index
    %c0_91 = arith.constant 0 : index
    %c0_92 = arith.constant 0 : index
    %160 = vector.load %arg9[%c0_90, %c0_91, %c0_92] : memref<1x1x32xf32, #tpu.memory_space<vmem>>, vector<1x1x32xf32>
    %161 = vector.shape_cast %160 : vector<1x1x32xf32> to vector<1x32xf32>
    %cst_93 = arith.constant dense<0.000000e+00> : vector<8xf32>
    %162 = vector.multi_reduction <add>, %157, %cst_93 [1] : vector<8x32xf32> to vector<8xf32>
    %163 = vector.shape_cast %162 : vector<8xf32> to vector<8x1xf32>
    %cst_94 = arith.constant 3.200000e+01 : f32
    %164 = vector.broadcast %cst_94 : f32 to vector<8x1xf32>
    %165 = arith.divf %163, %164 : vector<8x1xf32>
    %166 = vector.broadcast %165 : vector<8x1xf32> to vector<8x32xf32>
    %167 = arith.subf %157, %166 : vector<8x32xf32>
    %168 = arith.mulf %167, %167 : vector<8x32xf32>
    %cst_95 = arith.constant dense<0.000000e+00> : vector<8xf32>
    %169 = vector.multi_reduction <add>, %168, %cst_95 [1] : vector<8x32xf32> to vector<8xf32>
    %170 = vector.shape_cast %169 : vector<8xf32> to vector<8x1xf32>
    %cst_96 = arith.constant 3.200000e+01 : f32
    %171 = vector.broadcast %cst_96 : f32 to vector<8x1xf32>
    %172 = arith.divf %170, %171 : vector<8x1xf32>
    %cst_97 = arith.constant 9.99999974E-6 : f32
    %173 = vector.broadcast %cst_97 : f32 to vector<8x1xf32>
    %174 = arith.addf %172, %173 : vector<8x1xf32>
    %175 = math.rsqrt %174 : vector<8x1xf32>
    %176 = vector.broadcast %175 : vector<8x1xf32> to vector<8x32xf32>
    %177 = arith.mulf %167, %176 : vector<8x32xf32>
    %178 = vector.broadcast %159 : vector<1x32xf32> to vector<8x32xf32>
    %179 = arith.mulf %177, %178 : vector<8x32xf32>
    %180 = vector.broadcast %161 : vector<1x32xf32> to vector<8x32xf32>
    %181 = arith.addf %179, %180 : vector<8x32xf32>
    %c0_98 = arith.constant 0 : index
    %c0_99 = arith.constant 0 : index
    %c0_100 = arith.constant 0 : index
    %182 = vector.load %arg10[%c0_98, %c0_99, %c0_100] : memref<1x32x128xbf16, #tpu.memory_space<vmem>>, vector<1x32x128xbf16>
    %183 = vector.shape_cast %182 : vector<1x32x128xbf16> to vector<32x128xbf16>
    %184 = arith.truncf %181 : vector<8x32xf32> to vector<8x32xbf16>
    %cst_101 = arith.constant dense<0.000000e+00> : vector<8x128xf32>
    %185 = tpu.matmul %184, %183, %cst_101 {dimension_numbers = #tpu.dot_dimension_numbers<[1], [0], [0], [1], [0, 0, 1, 1], [], []>} : vector<8x32xbf16>, vector<32x128xbf16>, vector<8x128xf32> -> vector<8x128xf32>
    %c0_102 = arith.constant 0 : index
    %c0_103 = arith.constant 0 : index
    %c0_104 = arith.constant 0 : index
    %186 = vector.load %arg11[%c0_102, %c0_103, %c0_104] : memref<1x1x128xf32, #tpu.memory_space<vmem>>, vector<1x1x128xf32>
    %187 = vector.shape_cast %186 : vector<1x1x128xf32> to vector<1x128xf32>
    %188 = vector.broadcast %187 : vector<1x128xf32> to vector<8x128xf32>
    %189 = arith.addf %185, %188 : vector<8x128xf32>
    %cst_105 = arith.constant 5.000000e-01 : f32
    %190 = vector.broadcast %cst_105 : f32 to vector<8x128xf32>
    %191 = arith.mulf %190, %189 : vector<8x128xf32>
    %cst_106 = arith.constant 4.471500e-02 : f32
    %192 = vector.broadcast %cst_106 : f32 to vector<8x128xf32>
    %193 = arith.mulf %192, %189 : vector<8x128xf32>
    %194 = arith.mulf %193, %189 : vector<8x128xf32>
    %195 = arith.mulf %194, %189 : vector<8x128xf32>
    %196 = arith.addf %189, %195 : vector<8x128xf32>
    %cst_107 = arith.constant 0.797884583 : f32
    %197 = vector.broadcast %cst_107 : f32 to vector<8x128xf32>
    %198 = arith.mulf %197, %196 : vector<8x128xf32>
    %199 = math.tanh %198 : vector<8x128xf32>
    %cst_108 = arith.constant 1.000000e+00 : f32
    %200 = vector.broadcast %cst_108 : f32 to vector<8x128xf32>
    %201 = arith.addf %200, %199 : vector<8x128xf32>
    %202 = arith.mulf %191, %201 : vector<8x128xf32>
    %c0_109 = arith.constant 0 : index
    %c0_110 = arith.constant 0 : index
    %c0_111 = arith.constant 0 : index
    %203 = vector.load %arg12[%c0_109, %c0_110, %c0_111] : memref<1x128x32xbf16, #tpu.memory_space<vmem>>, vector<1x128x32xbf16>
    %204 = vector.shape_cast %203 : vector<1x128x32xbf16> to vector<128x32xbf16>
    %205 = arith.truncf %202 : vector<8x128xf32> to vector<8x128xbf16>
    %cst_112 = arith.constant dense<0.000000e+00> : vector<8x32xf32>
    %206 = tpu.matmul %205, %204, %cst_112 {dimension_numbers = #tpu.dot_dimension_numbers<[1], [0], [0], [1], [0, 0, 1, 1], [], []>} : vector<8x128xbf16>, vector<128x32xbf16>, vector<8x32xf32> -> vector<8x32xf32>
    %c0_113 = arith.constant 0 : index
    %c0_114 = arith.constant 0 : index
    %c0_115 = arith.constant 0 : index
    %207 = vector.load %arg13[%c0_113, %c0_114, %c0_115] : memref<1x1x32xf32, #tpu.memory_space<vmem>>, vector<1x1x32xf32>
    %208 = vector.shape_cast %207 : vector<1x1x32xf32> to vector<1x32xf32>
    %209 = vector.broadcast %208 : vector<1x32xf32> to vector<8x32xf32>
    %210 = arith.addf %206, %209 : vector<8x32xf32>
    %211 = arith.addf %157, %210 : vector<8x32xf32>
    %c0_116 = arith.constant 0 : index
    %c0_117 = arith.constant 0 : index
    %c0_118 = arith.constant 0 : index
    %212 = vector.load %arg19[%c0_116, %c0_117, %c0_118] : memref<1x8x32xf32, #tpu.memory_space<vmem>>, vector<1x8x32xf32>
    %213 = vector.shape_cast %212 : vector<1x8x32xf32> to vector<8x32xf32>
    %214 = vector.shape_cast %37 : vector<8x32xf32> to vector<1x8x32xf32>
    tpu.vector_store %arg19[%c0_116, %c0_117, %c0_118], %214 {strides = array<i32>} : memref<1x8x32xf32, #tpu.memory_space<vmem>>, vector<1x8x32xf32>,
    %c0_119 = arith.constant 0 : index
    %c0_120 = arith.constant 0 : index
    %c0_121 = arith.constant 0 : index
    %215 = vector.load %arg20[%c0_119, %c0_120, %c0_121] : memref<1x8x32xf32, #tpu.memory_space<vmem>>, vector<1x8x32xf32>
    %216 = vector.shape_cast %215 : vector<1x8x32xf32> to vector<8x32xf32>
    %217 = vector.shape_cast %38 : vector<8x32xf32> to vector<1x8x32xf32>
    tpu.vector_store %arg20[%c0_119, %c0_120, %c0_121], %217 {strides = array<i32>} : memref<1x8x32xf32, #tpu.memory_space<vmem>>, vector<1x8x32xf32>,
    %c0_122 = arith.constant 0 : index
    %c0_123 = arith.constant 0 : index
    %218 = vector.load %arg14[%c0_122, %c0_123] : memref<1x32xf32, #tpu.memory_space<vmem>>, vector<1x32xf32>
    %c0_124 = arith.constant 0 : index
    %c0_125 = arith.constant 0 : index
    %219 = vector.load %arg15[%c0_124, %c0_125] : memref<1x32xf32, #tpu.memory_space<vmem>>, vector<1x32xf32>
    %cst_126 = arith.constant dense<0.000000e+00> : vector<8xf32>
    %220 = vector.multi_reduction <add>, %211, %cst_126 [1] : vector<8x32xf32> to vector<8xf32>
    %221 = vector.shape_cast %220 : vector<8xf32> to vector<8x1xf32>
    %cst_127 = arith.constant 3.200000e+01 : f32
    %222 = vector.broadcast %cst_127 : f32 to vector<8x1xf32>
    %223 = arith.divf %221, %222 : vector<8x1xf32>
    %224 = vector.broadcast %223 : vector<8x1xf32> to vector<8x32xf32>
    %225 = arith.subf %211, %224 : vector<8x32xf32>
    %226 = arith.mulf %225, %225 : vector<8x32xf32>
    %cst_128 = arith.constant dense<0.000000e+00> : vector<8xf32>
    %227 = vector.multi_reduction <add>, %226, %cst_128 [1] : vector<8x32xf32> to vector<8xf32>
    %228 = vector.shape_cast %227 : vector<8xf32> to vector<8x1xf32>
    %cst_129 = arith.constant 3.200000e+01 : f32
    %229 = vector.broadcast %cst_129 : f32 to vector<8x1xf32>
    %230 = arith.divf %228, %229 : vector<8x1xf32>
    %cst_130 = arith.constant 9.99999974E-6 : f32
    %231 = vector.broadcast %cst_130 : f32 to vector<8x1xf32>
    %232 = arith.addf %230, %231 : vector<8x1xf32>
    %233 = math.rsqrt %232 : vector<8x1xf32>
    %234 = vector.broadcast %233 : vector<8x1xf32> to vector<8x32xf32>
    %235 = arith.mulf %225, %234 : vector<8x32xf32>
    %236 = vector.broadcast %218 : vector<1x32xf32> to vector<8x32xf32>
    %237 = arith.mulf %235, %236 : vector<8x32xf32>
    %238 = vector.broadcast %219 : vector<1x32xf32> to vector<8x32xf32>
    %239 = arith.addf %237, %238 : vector<8x32xf32>
    %c1_i32 = arith.constant 1 : i32
    %240 = arith.cmpi eq, %arg0, %c1_i32 : i32
    %241 = arith.select %240, %239, %211 : vector<8x32xf32>
    %c0_131 = arith.constant 0 : index
    %c0_132 = arith.constant 0 : index
    %242 = vector.load %arg18[%c0_131, %c0_132] : memref<8x32xf32, #tpu.memory_space<vmem>>, vector<8x32xf32>
    tpu.vector_store %arg18[%c0_131, %c0_132], %241 {strides = array<i32>} : memref<8x32xf32, #tpu.memory_space<vmem>>, vector<8x32xf32>,
    return
  }
  func.func @transform_0(%arg0: i32) -> (i32, i32) {
    %c0_i32 = arith.constant 0 : i32
    %c0_i32_0 = arith.constant 0 : i32
    %c0_i32_1 = arith.constant 0 : i32
    return %c0_i32, %c0_i32_0 : i32, i32
  }
  func.func @transform_1(%arg0: i32) -> (i32, i32, i32) {
    %c0_i32 = arith.constant 0 : i32
    %c0_i32_0 = arith.constant 0 : i32
    %c0_i32_1 = arith.constant 0 : i32
    return %arg0, %c0_i32, %c0_i32_0 : i32, i32, i32
  }
  func.func @transform_2(%arg0: i32) -> (i32, i32, i32) {
    %c0_i32 = arith.constant 0 : i32
    %c0_i32_0 = arith.constant 0 : i32
    %c0_i32_1 = arith.constant 0 : i32
    return %arg0, %c0_i32, %c0_i32_0 : i32, i32, i32
  }
  func.func @transform_3(%arg0: i32) -> (i32, i32, i32) {
    %c0_i32 = arith.constant 0 : i32
    %c0_i32_0 = arith.constant 0 : i32
    %c0_i32_1 = arith.constant 0 : i32
    return %arg0, %c0_i32, %c0_i32_0 : i32, i32, i32
  }
  func.func @transform_4(%arg0: i32) -> (i32, i32, i32) {
    %c0_i32 = arith.constant 0 : i32
    %c0_i32_0 = arith.constant 0 : i32
    %c0_i32_1 = arith.constant 0 : i32
    return %arg0, %c0_i32, %c0_i32_0 : i32, i32, i32
  }
  func.func @transform_5(%arg0: i32) -> (i32, i32, i32) {
    %c0_i32 = arith.constant 0 : i32
    %c0_i32_0 = arith.constant 0 : i32
    %c0_i32_1 = arith.constant 0 : i32
    return %arg0, %c0_i32, %c0_i32_0 : i32, i32, i32
  }
  func.func @transform_6(%arg0: i32) -> (i32, i32, i32) {
    %c0_i32 = arith.constant 0 : i32
    %c0_i32_0 = arith.constant 0 : i32
    %c0_i32_1 = arith.constant 0 : i32
    return %arg0, %c0_i32, %c0_i32_0 : i32, i32, i32
  }
  func.func @transform_7(%arg0: i32) -> (i32, i32, i32) {
    %c0_i32 = arith.constant 0 : i32
    %c0_i32_0 = arith.constant 0 : i32
    %c0_i32_1 = arith.constant 0 : i32
    return %arg0, %c0_i32, %c0_i32_0 : i32, i32, i32
  }
  func.func @transform_8(%arg0: i32) -> (i32, i32, i32) {
    %c0_i32 = arith.constant 0 : i32
    %c0_i32_0 = arith.constant 0 : i32
    %c0_i32_1 = arith.constant 0 : i32
    return %arg0, %c0_i32, %c0_i32_0 : i32, i32, i32
  }
  func.func @transform_9(%arg0: i32) -> (i32, i32, i32) {
    %c0_i32 = arith.constant 0 : i32
    %c0_i32_0 = arith.constant 0 : i32
    %c0_i32_1 = arith.constant 0 : i32
    return %arg0, %c0_i32, %c0_i32_0 : i32, i32, i32
  }
  func.func @transform_10(%arg0: i32) -> (i32, i32, i32) {
    %c0_i32 = arith.constant 0 : i32
    %c0_i32_0 = arith.constant 0 : i32
    %c0_i32_1 = arith.constant 0 : i32
    return %arg0, %c0_i32, %c0_i32_0 : i32, i32, i32
  }
  func.func @transform_11(%arg0: i32) -> (i32, i32, i32) {
    %c0_i32 = arith.constant 0 : i32
    %c0_i32_0 = arith.constant 0 : i32
    %c0_i32_1 = arith.constant 0 : i32
    return %arg0, %c0_i32, %c0_i32_0 : i32, i32, i32
  }
  func.func @transform_12(%arg0: i32) -> (i32, i32, i32) {
    %c0_i32 = arith.constant 0 : i32
    %c0_i32_0 = arith.constant 0 : i32
    %c0_i32_1 = arith.constant 0 : i32
    return %arg0, %c0_i32, %c0_i32_0 : i32, i32, i32
  }
  func.func @transform_13(%arg0: i32) -> (i32, i32) {
    %c0_i32 = arith.constant 0 : i32
    %c0_i32_0 = arith.constant 0 : i32
    %c0_i32_1 = arith.constant 0 : i32
    return %c0_i32, %c0_i32_0 : i32, i32
  }
  func.func @transform_14(%arg0: i32) -> (i32, i32) {
    %c0_i32 = arith.constant 0 : i32
    %c0_i32_0 = arith.constant 0 : i32
    %c0_i32_1 = arith.constant 0 : i32
    return %c0_i32, %c0_i32_0 : i32, i32
  }
  func.func @transform_15(%arg0: i32) -> (i32, i32, i32) {
    %c0_i32 = arith.constant 0 : i32
    %c0_i32_0 = arith.constant 0 : i32
    %c0_i32_1 = arith.constant 0 : i32
    return %arg0, %c0_i32, %c0_i32_0 : i32, i32, i32
  }
  func.func @transform_16(%arg0: i32) -> (i32, i32, i32) {
    %c0_i32 = arith.constant 0 : i32
    %c0_i32_0 = arith.constant 0 : i32
    %c0_i32_1 = arith.constant 0 : i32
    return %arg0, %c0_i32, %c0_i32_0 : i32, i32, i32
  }
  func.func @transform_17(%arg0: i32) -> (i32, i32) {
    %c0_i32 = arith.constant 0 : i32
    %c0_i32_0 = arith.constant 0 : i32
    %c0_i32_1 = arith.constant 0 : i32
    return %c0_i32, %c0_i32_0 : i32, i32
  }
  func.func @transform_18(%arg0: i32) -> (i32, i32, i32) {
    %c1_i32 = arith.constant 1 : i32
    %c0_i32 = arith.constant 0 : i32
    %c0_i32_0 = arith.constant 0 : i32
    return %arg0, %c1_i32, %c0_i32 : i32, i32, i32
  }
  func.func @transform_19(%arg0: i32) -> (i32, i32, i32) {
    %c1_i32 = arith.constant 1 : i32
    %c0_i32 = arith.constant 0 : i32
    %c0_i32_0 = arith.constant 0 : i32
    return %arg0, %c1_i32, %c0_i32 : i32, i32, i32
  }
}

</mosaic_0001>

<bundles_post_ra>
// kernel: gpt2_forward.1
= control target key start
LH: loop header
LB: loop body
LE: loop exit
PB: predicated region body
PF: predicated region fallthrough
CT: control target
= control target key end

     0   :  { %s2739_s0 = inlined_call_operand.vmem [shape: f32[8,32], index: 0, kind: input, shape index: {}]   ;;  %s2740_s1 = inlined_call_operand.vmem [shape: f32[2,1,32], index: 1, kind: input, shape index: {}]   ;;  %s2741_s2 = inlined_call_operand.vmem [shape: f32[2,1,32], index: 2, kind: input, shape index: {}]   ;;  %s2742_s3 = inlined_call_operand.vmem [shape: bf16[2,32,96], index: 3, kind: input, shape index: {}]   ;;  %s2743_s4 = inlined_call_operand.vmem [shape: f32[2,1,96], index: 4, kind: input, shape index: {}]   ;;  %s2744_s5 = inlined_call_operand.vmem [shape: bf16[2,32,32], index: 5, kind: input, shape index: {}]   ;;  %s2745_s6 = inlined_call_operand.vmem [shape: f32[2,1,32], index: 6, kind: input, shape index: {}]   ;;  %s2746_s7 = inlined_call_operand.vmem [shape: f32[2,1,32], index: 7, kind: input, shape index: {}]   ;;  %s2747_s8 = inlined_call_operand.vmem [shape: f32[2,1,32], index: 8, kind: input, shape index: {}]   ;;  %s2748_s9 = inlined_call_operand.vmem [shape: bf16[2,32,128], index: 9, kind: input, shape index: {}]   ;;  %s2749_s10 = inlined_call_operand.vmem [shape: f32[2,1,128], index: 10, kind: input, shape index: {}]   ;;  %s2750_s11 = inlined_call_operand.vmem [shape: bf16[2,128,32], index: 11, kind: input, shape index: {}]   ;;  %s2751_s12 = inlined_call_operand.vmem [shape: f32[2,1,32], index: 12, kind: input, shape index: {}]   ;;  %s2752_s13 = inlined_call_operand.vmem [shape: f32[1,32], index: 13, kind: input, shape index: {}]   ;;  %s2753_s14 = inlined_call_operand.vmem [shape: f32[1,32], index: 14, kind: input, shape index: {}]   ;;  %s2754_s15 = inlined_call_operand.vmem [shape: f32[2,16,32], index: 15, kind: input, shape index: {}, may-alias: {15,18}]   ;;  %s2755_s16 = inlined_call_operand.vmem [shape: f32[2,16,32], index: 16, kind: input, shape index: {}, may-alias: {16,19}]   ;;  %s2756_s17 = inlined_call_operand.hbm [shape: f32[8,32], index: 17, kind: output, shape index: {0}]   ;;  %s2757_s18 = inlined_call_operand.vmem [shape: f32[2,16,32], index: 18, kind: output, shape index: {1}, may-alias: {15,18}]   ;;  %s2758_s19 = inlined_call_operand.vmem [shape: f32[2,16,32], index: 19, kind: output, shape index: {2}, may-alias: {16,19}]  }
   0x1   :  { %2761 = sst [smem:[#allocation10_spill]] %s2739_s0 }
   0x2   :  { %2762 = sst [smem:[#allocation11_spill]] %s2740_s1 }
   0x3   :  { %2763 = sst [smem:[#allocation12_spill]] %s2741_s2 }
   0x4   :  { %2764 = sst [smem:[#allocation13_spill]] %s2742_s3 }
   0x5   :  { %2765 = sst [smem:[#allocation14_spill]] %s2743_s4 }
   0x6   :  { %2766 = sst [smem:[#allocation15_spill]] %s2744_s5 }
   0x7   :  { %2767 = sst [smem:[#allocation16_spill]] %s2748_s9 }
   0x8   :  { %2768 = sst [smem:[#allocation17_spill]] %s2749_s10 }
   0x9   :  { %2769 = sst [smem:[#allocation18_spill]] %s2752_s13 }
   0xa   :  { %2770 = sst [smem:[#allocation19_spill]] %s2753_s14 }
   0xb   :  { %2771 = sst [smem:[#allocation20_spill]] %s2756_s17 }
   0xc   :  { %25 = vsyncpa [#allocation6], 0  ;;  %s2437_s0 = smov 0  }
   0xd LB: > { %2772 = sst [smem:[#allocation8_spill]] %s2324_s0  ;;  %s2443_s30 = sadd.s32 4294967295, %s2324_s0   ;;  %s2324_s0 = sphi %s2437_s0, %s31_s0  }
   0xe   : > { %p2034_p0 = scmp.ge.s32.totalorder %s2324_s0, 1  ;;  %p652_p1 = scmp.lt.s32.totalorder %s2324_s0, 3 }
  0x10   : > { %p653_p2 = pnand %p2034_p0, %p652_p1 }
  0x12   : > { %656 = sbr.rel (%p653_p2) target bundleno = 2894 (0xb4e), region = 88 }
  0x17   : > { %p764_p3 = scmp.lt.s32.totalorder %s2443_s30, 1  ;;  %s2776_s22 = sld [smem:[#allocation13_spill]] }
  0x18   : > { %s2777_s5 = sld [smem:[#allocation15_spill]]  ;;  %p2051_p4 = scmp.ne.s32.totalorder %s2443_s30, 0 }
  0x19   : > { %s2449_s20 = scalar_select %p764_p3, %s2443_s30, 1 }
  0x1a   : > { %s2779_s9 = sld [smem:[#allocation16_spill]] }
  0x1b   : > { %s2460_s26 = sshll.u32 %s2449_s20, 4  ;;  %s807_s13 = scalar_lea.vmem %s2751_s12, %s2449_s20 }
  0x1c   : > { %s812_s21 = scalar_lea.vmem %s2754_s15, %s2460_s26  ;;  %s2781_s0 = sld [smem:[#allocation10_spill]] (!%p2051_p4) }
  0x1d   : > { %s2470_s2 = scalar_lea.vmem %s2776_s22, %s2460_s26  ;;  %834 = sbr.rel (%p2051_p4) target bundleno = 36 (0x24), region = 92 }
  0x1e   : > { %s2476_s25 = scalar_lea.vmem %s2777_s5, %s2460_s26  ;;  %s1895_s5 = scalar_lea.vmem %s2757_s18, %s2460_s26 }
  0x1f   : > { %2778 = sst [smem:[#allocation9_spill]] %s2476_s25  ;;  %s2096_s25 = sshll.u32 %s2449_s20, 6 }
  0x20   : > { %s2494_s22 = scalar_lea.vmem %s2779_s9, %s2460_s26  ;;  %s2504_s28 = scalar_lea.vmem %s2750_s11, %s2096_s25 }
  0x21   : > { %s817_s9 = scalar_lea.vmem %s2755_s16, %s2460_s26  ;;  %s1899_s25 = scalar_lea.vmem %s2758_s19, %s2460_s26 }
  0x22   : > { %v835_v0 = vld [vmem:[%s2781_s0] sm:$0xff]  ;;  %vm836_vm0 = vcmask 261120  }
  0x23   : > { %837 = vst.msk [vmem:[#allocation5] sm:$0xff] %vm836_vm0, %v835_v0 }
  0x24 PF: > { %vm841_vm1 = vcmask 261120   ;;  %v2252_v8 = vld [vmem:[%s2470_s2 + $0x8] sm:$0xff]   ;;  %v2326_v9 = vmov 0.0   ;;  %vm2327_vm2 = vmmov 0   ;;  %v2253_v10 = vld [vmem:[%s2470_s2] sm:$0xff]   ;;  %s2782_s14 = sld [smem:[#allocation11_spill]]  ;;  %v950_v43 = vlaneseq  ;;  %s2790_s29 = scalar_lea.vmem %s2746_s7, %s2449_s20 }
  0x25   : > { %2135 = vmatprep.subr.bf16.mxu0 %v2326_v9  ;;  %2139 = vmatprep.mubr.msk.bf16.mxu0 %vm2327_vm2, %v2326_v9  ;;  %s2784_s23 = sld [smem:[#allocation12_spill]]  ;;  %v937_v21 = vld [vmem:[%s812_s21] sm:$0xff]  ;;  %vm962_vm3 = vcmask 64512   ;;  %s2330_s1 = smov 112   ;;  %vm1011_vm5 = vcmask 130048   ;;  %vm1192_vm6 = vcmask 130112  }
  0x26   : > { %2136 = vmatpush3.bf16.msra.mxu0 %v2252_v8  ;;  %2155 = vmatprep.subr.bf16.mxu1 %v2326_v9  ;;  %938 = vst.msk [vmem:[#allocation2] sm:$0xff] %vm841_vm1, %v937_v21  ;;  %s2786_s4 = sld [smem:[#allocation14_spill]]  ;;  %v951_v44 = vshrl.u32 %v950_v43, 7  ;;  %v953_v45 = vand.u32 127, %v950_v43  ;;  %s2332_s3 = smov 64   ;;  %vm1316_vm7 = vcmask 195712  }
  0x27   : > { %2137 = vmatprep.subr.bf16.mxu0 %v2326_v9  ;;  %2157 = vmatprep.mubr.msk.bf16.mxu1 %vm2327_vm2, %v2326_v9  ;;  %s2788_s26 = sld [smem:[#allocation9_spill]]  ;;  %s2334_s17 = smov 16   ;;  %vm1440_vm8 = vcmask 261312  }
  0x28   : > { %v954_v46 = vadd.s32 8, %v951_v44  ;;  %s2335_s0 = smov 24   ;;  %p1760_p5 = scmp.eq.s32.totalorder %s2443_s30, 1 }
  0x2a   : > { %v2530_v1 = vld [vmem:[#allocation5] sm:$0xff]  ;;  %2138 = vmatpush3.bf16.msra.mxu0 %v2253_v10  ;;  %s2783_s2 = scalar_lea.vmem %s2782_s14, %s2449_s20  ;;  %s2328_s14 = smov 96   ;;  %vm955_vm4 = vcmp.le.s32.totalorder %v953_v45, %v954_v46 }
  0x2b   : > { %v842_v2 = vsel %vm841_vm1, %v2530_v1, 0.0  ;;  %2143 = vmatprep.subr.bf16.mxu0 %v2326_v9  ;;  %v2052_v15 = vld [vmem:[%s2783_s2] ss:$0 sm:$0xff]  ;;  %s2785_s24 = scalar_lea.vmem %s2784_s23, %s2449_s20  ;;  %s2329_s2 = smov 120  }
  0x2c   : > { %843 = vadd.xlane.f32.xlu0 %v842_v2  ;;  %v2053_v17 = vld [vmem:[%s2785_s24] ss:$0 sm:$0xff]  ;;  %s2787_s10 = scalar_lea.vmem %s2786_s4, %s2449_s20  ;;  %s2795_s4 = sld [smem:[#allocation19_spill]] }
  0x2d   : > { %v2054_v22 = vld [vmem:[%s2787_s10] ss:$0 sm:$0xff]  ;;  %s2336_s10 = smov [#allocation5]  }
  0x2e   : > { %v1069_v30 = vld [vmem:[#allocation2] sm:$0xff] }
  0xb5   : > { %v844_v3 = vpop.xlane.xlu0 %843 }
  0xb6   : > { %v846_v4 = vmul.f32 0.03125, %v844_v3 }
  0xb8   : > { %v847_v5 = vsub.f32 %v2530_v1, %v846_v4 }
  0xba   : > { %v848_v6 = vmul.f32 %v847_v5, %v847_v5 }
  0xbc   : > { %v849_v7 = vsel %vm841_vm1, %v848_v6, 0.0 }
  0xbd   : > { %850 = vadd.xlane.f32.xlu0 %v849_v7 }
 0x146   : > { %v851_v11 = vpop.xlane.xlu0 %850 }
 0x147   : > { %v852_v12 = vmul.f32 0.03125, %v851_v11 }
 0x149   : > { %v853_v13 = vadd.f32 1e-05, %v852_v12 }
 0x14b   : > { %2266 = vrsqrt.f32 %v853_v13  ;;  %v944_v13 = vld [vmem:[%s817_s9] sm:$0xff] }
 0x14c   : > { %945 = vst.msk [vmem:[#allocation3] sm:$0xff] %vm841_vm1, %v944_v13 }
 0x158   : > { %v2267_v14 = vpop.eup %2266 }
 0x159   : > { %v855_v16 = vmul.f32 %v2267_v14, %v847_v5 }
 0x15b   : > { %v862_v18 = vmul.f32 %v2052_v15, %v855_v16 }
 0x15d   : > { %v869_v19 = vadd.f32 %v2053_v17, %v862_v18 }
 0x15f   : > { %v874_v20 = vpack.c.bf16 %v869_v19, %v869_v19 }
 0x161   : > { %2140 = vmatmul.mubr.msk.bf16.vlgmr.msra.gmra.mxu0 %vm841_vm1, %v874_v20 }
 0x162   : > { %2145 = vmatprep.mubr.msk.bf16.mxu0 %vm2327_vm2, %v2326_v9 }
 0x221   : > { %v931_v23 = vpop.f32.mrf.mxu0 }
 0x222   : > { %v2570_v24 = vadd.f32 %v2054_v22, %v931_v23 }
 0x223   : > { %v2141_v25 = vpop.f32.mrf.mxu0 }
 0x224   : > { %v960_v26 = vpack.c.bf16 %v2570_v24, %v2570_v24  ;;  %940 = vrot.lane.b32.xlu1 %v2570_v24, %s2328_s14  ;;  %s2789_s14 = scalar_lea.vmem %s2745_s6, %s2449_s20 }
 0x225   : > { %v934_v27 = vpop.f32.mrf.mxu0 }
 0x226   : > { %1075 = vrot.lane.b32.xlu0 %v960_v26, %s2329_s2 }
 0x227   : > { %v2142_v28 = vpop.f32.mrf.mxu0 }
 0x296   : > { %v941_v29 = vpop.permute.xlu1 %940 }
 0x297   : > { %943 = vst.msk [vmem:[#allocation2 + $0x8] sm:$0xff] %vm841_vm1, %v941_v29  ;;  %2085 = vst.msk [vmem:[%s1895_s5 + $0x8] sm:$0xff] %vm841_vm1, %v941_v29  ;;  %s2331_s5 = smov 104   ;;  %v1196_v29 = vld [vmem:[#allocation3] sm:$0xff] }
 0x298   : > { %v1076_v37 = vpop.permute.xlu0 %1075 }
 0x29e   : > { %v1070_v31 = vld [vmem:[#allocation2 + $0x8] sm:$0xff] }
 0x29f   : > { %v1073_v32 = vpack.c.bf16 %v1070_v31, %v1069_v30 }
 0x2a1   : > { %1078 = vrot.lane.b32.xlu1 %v1073_v32, %s2329_s2  ;;  %v967_v33 = vsel %vm962_vm3, %v1073_v32, 0 }
 0x2a2   : > { %2144 = vmatpush3.bf16.xpose.msra.mxu0 %v967_v33 }
 0x2a3   : > { %2149 = vmatprep.subr.bf16.mxu0 %v2326_v9 }
 0x2a5   : > { %1202 = vrot.lane.b32.xlu1 %v1073_v32, %s2330_s1 }
 0x2a9   : > { %1199 = vrot.lane.b32.xlu1 %v960_v26, %s2330_s1  ;;  %2146 = vmatmul.mubr.msk.bf16.vlgmr.msra.gmra.mxu0 %vm962_vm3, %v960_v26 }
 0x2aa   : > { %2151 = vmatprep.mubr.msk.bf16.mxu0 %vm2327_vm2, %v2326_v9 }
 0x2ad   : > { %1326 = vrot.lane.b32.xlu1 %v1073_v32, %s2331_s5 }
 0x2b1   : > { %1323 = vrot.lane.b32.xlu1 %v960_v26, %s2331_s5 }
 0x313   : > { %v1079_v34 = vpop.permute.xlu1 %1078 }
 0x314   : > { %v1084_v35 = vsel %vm962_vm3, %v1079_v34, 0 }
 0x315   : > { %2156 = vmatpush3.bf16.xpose.msra.mxu1 %v1084_v35 }
 0x316   : > { %2167 = vmatprep.subr.bf16.mxu1 %v2326_v9 }
 0x317   : > { %v1203_v36 = vpop.permute.xlu1 %1202 }
 0x318   : > { %v1208_v39 = vsel %vm962_vm3, %v1203_v36, 0 }
 0x31b   : > { %v1200_v38 = vpop.permute.xlu1 %1199 }
 0x31c   : > { %2158 = vmatmul.mubr.msk.bf16.vlgmr.msra.gmra.mxu1 %vm962_vm3, %v1076_v37 }
 0x31d   : > { %2168 = vmatpush3.bf16.xpose.msra.mxu1 %v1208_v39  ;;  %2169 = vmatprep.mubr.msk.bf16.mxu1 %vm2327_vm2, %v2326_v9 }
 0x31e   : > { %2179 = vmatprep.subr.bf16.mxu1 %v2326_v9 }
 0x31f   : > { %v1327_v40 = vpop.permute.xlu1 %1326 }
 0x320   : > { %v1332_v41 = vsel %vm962_vm3, %v1327_v40, 0 }
 0x323   : > { %v1324_v42 = vpop.permute.xlu1 %1323 }
 0x324   : > { %2170 = vmatmul.mubr.msk.bf16.vlgmr.msra.gmra.mxu1 %vm962_vm3, %v1200_v38 }
 0x325   : > { %2180 = vmatpush3.bf16.xpose.msra.mxu1 %v1332_v41  ;;  %2181 = vmatprep.mubr.msk.bf16.mxu1 %vm2327_vm2, %v2326_v9 }
 0x326   : > { %2191 = vmatprep.subr.bf16.mxu1 %v2326_v9 }
 0x32c   : > { %2182 = vmatmul.mubr.msk.bf16.vlgmr.msra.gmra.mxu1 %vm962_vm3, %v1324_v42 }
 0x32d   : > { %2195 = vmatprep.mubr.msk.bf16.mxu1 %vm2327_vm2, %v2326_v9 }
 0x369   : > { %v1003_v47 = vpop.f32.mrf.mxu0 }
 0x36a   : > { %v1009_v48 = vmul.f32 0.35355338, %v1003_v47 }
 0x36b   : > { %v2147_v49 = vpop.f32.mrf.mxu0 }
 0x36c   : > { %v1010_v50 = vsel %vm955_vm4, %v1009_v48, -1e+30 }
 0x36d   : > { %v1006_v51 = vpop.f32.mrf.mxu0  ;;  %v1012_v52 = vsel %vm1011_vm5, %v1010_v50, -inf }
 0x36e   : > { %1013 = vmax.xlane.f32.xlu1 %v1012_v52 }
 0x36f   : > { %v2148_v53 = vpop.f32.mrf.mxu0 }
 0x3dc   : > { %v1120_v54 = vpop.f32.mrf.mxu1 }
 0x3dd   : > { %v1126_v55 = vmul.f32 0.35355338, %v1120_v54 }
 0x3de   : > { %v2159_v56 = vpop.f32.mrf.mxu1 }
 0x3df   : > { %v1127_v57 = vsel %vm955_vm4, %v1126_v55, -1e+30 }
 0x3e0   : > { %v1123_v58 = vpop.f32.mrf.mxu1  ;;  %v1128_v59 = vsel %vm1011_vm5, %v1127_v57, -inf }
 0x3e1   : > { %1129 = vmax.xlane.f32.xlu0 %v1128_v59 }
 0x3e2   : > { %v2160_v60 = vpop.f32.mrf.mxu1 }
 0x3e4   : > { %v1244_v61 = vpop.f32.mrf.mxu1 }
 0x3e5   : > { %v1250_v62 = vmul.f32 0.35355338, %v1244_v61 }
 0x3e6   : > { %v2171_v63 = vpop.f32.mrf.mxu1 }
 0x3e7   : > { %v1251_v0 = vsel %vm955_vm4, %v1250_v62, -1e+30 }
 0x3e8   : > { %v1247_v2 = vpop.f32.mrf.mxu1  ;;  %v1252_v3 = vsel %vm1011_vm5, %v1251_v0, -inf }
 0x3e9   : > { %1253 = vmax.xlane.f32.xlu1 %v1252_v3  ;;  %v2255_v3 = vld [vmem:[%s2788_s26] sm:$0xff]  }
 0x3ea   : > { %v2172_v4 = vpop.f32.mrf.mxu1 }
 0x3ec   : > { %v1368_v5 = vpop.f32.mrf.mxu1 }
 0x3ed   : > { %v1374_v6 = vmul.f32 0.35355338, %v1368_v5 }
 0x3ee   : > { %v2183_v7 = vpop.f32.mrf.mxu1 }
 0x3ef   : > { %v1375_v8 = vsel %vm955_vm4, %v1374_v6, -1e+30 }
 0x3f0   : > { %v1371_v10 = vpop.f32.mrf.mxu1  ;;  %v1376_v11 = vsel %vm1011_vm5, %v1375_v8, -inf }
 0x3f1   : > { %1377 = vmax.xlane.f32.xlu0 %v1376_v11 }
 0x3f2   : > { %v2184_v12 = vpop.f32.mrf.mxu1 }
 0x3f7   : > { %v1014_v14 = vpop.xlane.xlu1 %1013 }
 0x3f8   : > { %v1015_v15 = vsub.f32 %v1010_v50, %v1014_v14 }
 0x3fa   : > { %v1016_v16 = vmul.f32 1.442695, %v1015_v15  ;;  %946 = vrot.lane.b32.xlu1 %v2570_v24, %s2332_s3  ;;  %s2792_s3 = sld [smem:[#allocation17_spill]] }
 0x3fc   : > { %2268 = vpow2.f32 %v1016_v16 }
 0x400   : > { %s2793_s9 = scalar_lea.vmem %s2792_s3, %s2449_s20 }
 0x409   : > { %v2269_v17 = vpop.eup %2268 }
 0x40a   : > { %v1018_v18 = vsel %vm1011_vm5, %v2269_v17, 0.0 }
 0x40b   : > { %1019 = vadd.xlane.f32.xlu0 %v1018_v18  ;;  %v2066_v18 = vld [vmem:[%s2789_s14] ss:$0 sm:$0xff]  ;;  %s1785_s14 = sshll.u32 %s2336_s10, 4  ;;  %s1786_s14 = int_to_ptr.vmem [resolvable:$true] %s1785_s14 }
 0x40c   : > { %p2297_p9 = scmp.lt.s32.totalorder %s1786_s14, %s1786_s14 }
 0x46a   : > { %v1130_v19 = vpop.xlane.xlu0 %1129 }
 0x46b   : > { %v1131_v20 = vsub.f32 %v1127_v57, %v1130_v19 }
 0x46d   : > { %v1132_v21 = vmul.f32 1.442695, %v1131_v20 }
 0x46f   : > { %2270 = vpow2.f32 %v1132_v21 }
 0x472   : > { %v1254_v22 = vpop.xlane.xlu1 %1253 }
 0x473   : > { %v1255_v23 = vsub.f32 %v1251_v0, %v1254_v22  ;;  %v2254_v0 = vld [vmem:[%s2788_s26 + $0x8] sm:$0xff]  }
 0x474   : > { %2192 = vmatpush3.bf16.msra.mxu1 %v2254_v0 }
 0x475   : > { %v1256_v25 = vmul.f32 1.442695, %v1255_v23  ;;  %2193 = vmatprep.subr.bf16.mxu1 %v2326_v9 }
 0x476   : > { %v947_v26 = vpop.permute.xlu1 %946 }
 0x477   : > { %2272 = vpow2.f32 %v1256_v25  ;;  %949 = vst.msk [vmem:[#allocation3 + $0x8] sm:$0xff] %vm841_vm1, %v947_v26  ;;  %2086 = vst.msk [vmem:[%s1899_s25 + $0x8] sm:$0xff] %vm841_vm1, %v947_v26  ;;  %s2333_s25 = smov 8  }
 0x478   : > { %2194 = vmatpush3.bf16.msra.mxu1 %v2255_v3 }
 0x479   : > { %2207 = vmatprep.subr.bf16.mxu1 %v2326_v9 }
 0x47a   : > { %v1378_v24 = vpop.xlane.xlu0 %1377 }
 0x47b   : > { %v1379_v27 = vsub.f32 %v1375_v8, %v1378_v24 }
 0x47c   : > { %v2271_v28 = vpop.eup %2270 }
 0x47d   : > { %v1380_v30 = vmul.f32 1.442695, %v1379_v27  ;;  %v1134_v31 = vsel %vm1011_vm5, %v2271_v28, 0.0 }
 0x47e   : > { %1135 = vadd.xlane.f32.xlu0 %v1134_v31  ;;  %v1197_v32 = vld [vmem:[#allocation3 + $0x8] sm:$0xff]  ;;  %v2256_v31 = vld [vmem:[%s2494_s22 + $0x8] sm:$0xff]  }
 0x47f   : > { %2274 = vpow2.f32 %v1380_v30  ;;  %v1264_v33 = vpack.c.bf16 %v1197_v32, %v1196_v29 }
 0x481   : > { %1266 = vrot.lane.b32.xlu1 %v1264_v33, %s2330_s1  ;;  %2150 = vmatpush3.bf16.msra.mxu0 %v1264_v33 }
 0x482   : > { %2161 = vmatprep.subr.bf16.mxu0 %v2326_v9 }
 0x484   : > { %v2273_v34 = vpop.eup %2272 }
 0x485   : > { %1390 = vrot.lane.b32.xlu1 %v1264_v33, %s2331_s5  ;;  %v1258_v35 = vsel %vm1011_vm5, %v2273_v34, 0.0 }
 0x486   : > { %1259 = vadd.xlane.f32.xlu0 %v1258_v35 }
 0x48c   : > { %v2275_v36 = vpop.eup %2274 }
 0x48d   : > { %v1382_v37 = vsel %vm1011_vm5, %v2275_v36, 0.0 }
 0x48e   : > { %1383 = vadd.xlane.f32.xlu0 %v1382_v37 }
 0x494   : > { %v1020_v38 = vpop.xlane.xlu0 %1019 }
 0x495   : > { %2276 = vrcp.f32 %v1020_v38 }
 0x4a2   : > { %v2277_v39 = vpop.eup %2276 }
 0x4a3   : > { %v1022_v40 = vmul.f32 %v2277_v39, %v2269_v17 }
 0x4a4   : > { %1142 = vrot.lane.b32.xlu0 %v1264_v33, %s2329_s2  ;;  %s2290_s2 = scalar_lea.vmem %s1786_s14, 128 }
 0x4a5   : > { %v1023_v41 = vpack.c.bf16 %v1022_v40, %v1022_v40  ;;  %p2291_p6 = scmp.ne.s32.totalorder %s1786_s14, %s2290_s2  ;;  %p2298_p10 = scmp.lt.s32.totalorder %s2290_s2, %s2290_s2 }
 0x4a7   : > { %2152 = vmatmul.mubr.msk.bf16.vlgmr.msra.gmra.mxu0 %vm1011_vm5, %v1023_v41  ;;  %p2292_p7 = pnand %p2291_p6, %p1760_p5  ;;  %p2299_p11 = por %p2298_p10, %p2297_p9 }
 0x4a8   : > { %2163 = vmatprep.mubr.msk.bf16.mxu0 %vm2327_vm2, %v2326_v9 }
 0x4a9   : > { %p2293_p8 = pneg %p2292_p7 }
 0x4ab   : > { %p2300_p12 = pnand %p2299_p11, %p2293_p8 }
 0x4f3   : > { %v1267_v50 = vpop.permute.xlu1 %1266 }
 0x4f7   : > { %v1391_v54 = vpop.permute.xlu1 %1390 }
 0x507   : > { %v1136_v42 = vpop.xlane.xlu0 %1135 }
 0x508   : > { %2278 = vrcp.f32 %v1136_v42  ;;  %v2258_v42 = vld [vmem:[%s2504_s28 + $0x38] sm:$0xff]  }
 0x50f   : > { %v1260_v43 = vpop.xlane.xlu0 %1259 }
 0x510   : > { %2280 = vrcp.f32 %v1260_v43  ;;  %v2259_v43 = vld [vmem:[%s2504_s28 + $0x30] sm:$0xff]  }
 0x515   : > { %v2279_v44 = vpop.eup %2278 }
 0x516   : > { %v1138_v46 = vmul.f32 %v2279_v44, %v2271_v28  ;;  %v2260_v44 = vld [vmem:[%s2504_s28 + $0x28] sm:$0xff]  }
 0x517   : > { %v1384_v45 = vpop.xlane.xlu0 %1383 }
 0x518   : > { %2282 = vrcp.f32 %v1384_v45  ;;  %v1139_v48 = vpack.c.bf16 %v1138_v46, %v1138_v46  ;;  %v2261_v45 = vld [vmem:[%s2504_s28 + $0x20] sm:$0xff]   ;;  %v2262_v46 = vld [vmem:[%s2504_s28 + $0x18] sm:$0xff]  }
 0x51b   : > { %v1143_v47 = vpop.permute.xlu0 %1142 }
 0x51c   : > { %2162 = vmatpush3.bf16.msra.mxu0 %v1143_v47  ;;  %v2263_v47 = vld [vmem:[%s2504_s28 + $0x10] sm:$0xff]  }
 0x51d   : > { %2173 = vmatprep.subr.bf16.mxu0 %v2326_v9  ;;  %v2281_v49 = vpop.eup %2280 }
 0x51e   : > { %v1262_v51 = vmul.f32 %v2281_v49, %v2273_v34  ;;  %v2265_v49 = vld [vmem:[%s2504_s28] sm:$0xff]  }
 0x51f   : > { %2164 = vmatmul.mubr.msk.bf16.vlgmr.msra.gmra.mxu0 %vm1011_vm5, %v1139_v48  ;;  %v2264_v48 = vld [vmem:[%s2504_s28 + $0x8] sm:$0xff]  }
 0x520   : > { %2174 = vmatpush3.bf16.msra.mxu0 %v1267_v50  ;;  %2175 = vmatprep.mubr.msk.bf16.mxu0 %vm2327_vm2, %v2326_v9  ;;  %v1263_v52 = vpack.c.bf16 %v1262_v51, %v1262_v51  ;;  %v2072_v50 = vld [vmem:[%s2793_s9] ss:$0 sm:$0xff] }
 0x521   : > { %2185 = vmatprep.subr.bf16.mxu0 %v2326_v9 }
 0x525   : > { %v2283_v53 = vpop.eup %2282 }
 0x526   : > { %v1386_v55 = vmul.f32 %v2283_v53, %v2275_v36  ;;  %v2070_v36 = vld [vmem:[%s2790_s29] ss:$0 sm:$0xff] }
 0x527   : > { %2176 = vmatmul.mubr.msk.bf16.vlgmr.msra.gmra.mxu0 %vm1011_vm5, %v1263_v52 }
 0x528   : > { %2186 = vmatpush3.bf16.msra.mxu0 %v1391_v54  ;;  %2187 = vmatprep.mubr.msk.bf16.mxu0 %vm2327_vm2, %v2326_v9  ;;  %v1387_v56 = vpack.c.bf16 %v1386_v55, %v1386_v55 }
 0x529   : > { %2199 = vmatprep.subr.bf16.mxu0 %v2326_v9 }
 0x52f   : > { %2188 = vmatmul.mubr.msk.bf16.vlgmr.msra.gmra.mxu0 %vm1011_vm5, %v1387_v56 }
 0x530   : > { %2203 = vmatprep.mubr.msk.bf16.mxu0 %vm2327_vm2, %v2326_v9  ;;  %2200 = vmatpush3.bf16.msra.mxu0 %v2256_v31 }
 0x531   : > { %2201 = vmatprep.subr.bf16.mxu0 %v2326_v9 }
 0x567   : > { %v1062_v57 = vpop.f32.mrf.mxu0 }
 0x568   : > { %1068 = vst.msk [vmem:[#allocation4] sm:$0xff] %vm962_vm3, %v1062_v57 }
 0x569   : > { %v2153_v58 = vpop.f32.mrf.mxu0 }
 0x56b   : > { %v1065_v59 = vpop.f32.mrf.mxu0 }
 0x56d   : > { %v2154_v60 = vpop.f32.mrf.mxu0 }
 0x5df   : > { %v1182_v61 = vpop.f32.mrf.mxu0 }
 0x5e0   : > { %1189 = vrot.lane.b32.xlu1 %v1182_v61, %s2333_s25  ;;  %s2794_s25 = sld [smem:[#allocation18_spill]] }
 0x5e1   : > { %v2165_v62 = vpop.f32.mrf.mxu0 }
 0x5e3   : > { %v1185_v63 = vpop.f32.mrf.mxu0 }
 0x5e5   : > { %v2166_v2 = vpop.f32.mrf.mxu0 }
 0x5e6   : > { %v2076_v2 = vld [vmem:[%s807_s13] ss:$0 sm:$0xff] }
 0x5e7   : > { %v1306_v4 = vpop.f32.mrf.mxu0 }
 0x5e8   : > { %1313 = vrot.lane.b32.xlu1 %v1306_v4, %s2334_s17 }
 0x5e9   : > { %v2177_v5 = vpop.f32.mrf.mxu0 }
 0x5eb   : > { %v1309_v6 = vpop.f32.mrf.mxu0 }
 0x5ed   : > { %v2178_v7 = vpop.f32.mrf.mxu0 }
 0x5ef   : > { %v1430_v8 = vpop.f32.mrf.mxu0 }
 0x5f0   : > { %1437 = vrot.lane.b32.xlu1 %v1430_v8, %s2335_s0 }
 0x5f1   : > { %v2189_v10 = vpop.f32.mrf.mxu0 }
 0x5f3   : > { %v1433_v11 = vpop.f32.mrf.mxu0 }
 0x5f5   : > { %v2190_v12 = vpop.f32.mrf.mxu0 }
 0x652   : > { %v1190_v13 = vpop.permute.xlu1 %1189 }
 0x653   : > { %1193 = vst.msk [vmem:[#allocation4] sm:$0xff] %vm1192_vm6, %v1190_v13 }
 0x65a   : > { %v1314_v14 = vpop.permute.xlu1 %1313 }
 0x65b   : > { %1317 = vst.msk [vmem:[#allocation4] sm:$0xff] %vm1316_vm7, %v1314_v14 }
 0x662   : > { %v1438_v15 = vpop.permute.xlu1 %1437 }
 0x663   : > { %1441 = vst.msk [vmem:[#allocation4] sm:$0xff] %vm1440_vm8, %v1438_v15 }
 0x66a   : > { %v1442_v16 = vld [vmem:[#allocation4] sm:$0xff] }
 0x66b   : > { %v1447_v17 = vpack.c.bf16 %v1442_v16, %v1442_v16 }
 0x66d   : > { %2196 = vmatmul.mubr.msk.bf16.vlgmr.msra.gmra.mxu1 %vm841_vm1, %v1447_v17 }
 0x66e   : > { %2223 = vmatprep.mubr.msk.bf16.mxu1 %vm2327_vm2, %v2326_v9  ;;  %2208 = vmatpush3.bf16.msra.mxu1 %v2258_v42 }
 0x66f   : > { %2209 = vmatprep.subr.bf16.mxu1 %v2326_v9 }
 0x672   : > { %2210 = vmatpush3.bf16.msra.mxu1 %v2259_v43 }
 0x673   : > { %2211 = vmatprep.subr.bf16.mxu1 %v2326_v9 }
 0x676   : > { %2212 = vmatpush3.bf16.msra.mxu1 %v2260_v44 }
 0x677   : > { %2213 = vmatprep.subr.bf16.mxu1 %v2326_v9 }
 0x67a   : > { %2214 = vmatpush3.bf16.msra.mxu1 %v2261_v45 }
 0x67b   : > { %2215 = vmatprep.subr.bf16.mxu1 %v2326_v9 }
 0x67e   : > { %2216 = vmatpush3.bf16.msra.mxu1 %v2262_v46 }
 0x67f   : > { %2217 = vmatprep.subr.bf16.mxu1 %v2326_v9 }
 0x682   : > { %2218 = vmatpush3.bf16.msra.mxu1 %v2263_v47 }
 0x683   : > { %2219 = vmatprep.subr.bf16.mxu1 %v2326_v9 }
 0x686   : > { %2220 = vmatpush3.bf16.msra.mxu1 %v2264_v48 }
 0x687   : > { %2221 = vmatprep.subr.bf16.mxu1 %v2326_v9 }
 0x68a   : > { %2222 = vmatpush3.bf16.msra.mxu1 %v2265_v49 }
 0x72d   : > { %v1504_v19 = vpop.f32.mrf.mxu1 }
 0x72e   : > { %v1505_v20 = vadd.f32 %v2066_v18, %v1504_v19 }
 0x72f   : > { %v2197_v21 = vpop.f32.mrf.mxu1 }
 0x730   : > { %v2667_v22 = vadd.f32 %v1505_v20, %v2530_v1  ;;  %v2257_v1 = vld [vmem:[%s2494_s22] sm:$0xff]   ;;  %s2791_s22 = scalar_lea.vmem %s2747_s8, %s2449_s20 }
 0x731   : > { %v1507_v23 = vpop.f32.mrf.mxu1  ;;  %2202 = vmatpush3.bf16.msra.mxu0 %v2257_v1  ;;  %v2071_v38 = vld [vmem:[%s2791_s22] ss:$0 sm:$0xff]  ;;  %s1761_s20 = scalar_select %p1760_p5, 1, 0 }
 0x732   : > { %v1513_v25 = vsel %vm841_vm1, %v2667_v22, 0.0  ;;  %v2087_v20 = vld [vmem:[%s2794_s25] ss:$0 sm:$0xff] }
 0x733   : > { %1514 = vadd.xlane.f32.xlu1 %v1513_v25  ;;  %v2198_v26 = vpop.f32.mrf.mxu1  ;;  %v2088_v23 = vld [vmem:[%s2795_s4] ss:$0 sm:$0xff] }
 0x7bc   : > { %v1515_v24 = vpop.xlane.xlu1 %1514 }
 0x7bd   : > { %v1516_v27 = vmul.f32 0.03125, %v1515_v24 }
 0x7bf   : > { %v1517_v28 = vsub.f32 %v2667_v22, %v1516_v27 }
 0x7c1   : > { %v1518_v29 = vmul.f32 %v1517_v28, %v1517_v28 }
 0x7c3   : > { %v1519_v30 = vsel %vm841_vm1, %v1518_v29, 0.0 }
 0x7c4   : > { %1520 = vadd.xlane.f32.xlu0 %v1519_v30 }
 0x84d   : > { %v1521_v32 = vpop.xlane.xlu0 %1520 }
 0x84e   : > { %v1522_v33 = vmul.f32 0.03125, %v1521_v32 }
 0x850   : > { %v1523_v34 = vadd.f32 1e-05, %v1522_v33 }
 0x852   : > { %2284 = vrsqrt.f32 %v1523_v34 }
 0x85f   : > { %v2285_v35 = vpop.eup %2284 }
 0x860   : > { %v1525_v37 = vmul.f32 %v2285_v35, %v1517_v28 }
 0x862   : > { %v1532_v39 = vmul.f32 %v2070_v36, %v1525_v37 }
 0x864   : > { %v1539_v40 = vadd.f32 %v2071_v38, %v1532_v39 }
 0x866   : > { %v1544_v41 = vpack.c.bf16 %v1539_v40, %v1539_v40 }
 0x868   : > { %2204 = vmatmul.mubr.msk.bf16.vlgmr.msra.gmra.mxu0 %vm841_vm1, %v1544_v41 }
 0x928   : > { %v1601_v51 = vpop.f32.mrf.mxu0 }
 0x929   : > { %v1602_v52 = vadd.f32 %v2072_v50, %v1601_v51 }
 0x92a   : > { %v2205_v53 = vpop.f32.mrf.mxu0 }
 0x92b   : > { %v1608_v54 = vmul.f32 0.044715, %v1602_v52  ;;  %v1607_v9 = vmul.f32 0.5, %v1602_v52 }
 0x92c   : > { %v1604_v55 = vpop.f32.mrf.mxu0 }
 0x92d   : > { %v1609_v56 = vmul.f32 %v1608_v54, %v1602_v52 }
 0x92e   : > { %v2206_v57 = vpop.f32.mrf.mxu0 }
 0x92f   : > { %v1610_v58 = vmul.f32 %v1609_v56, %v1602_v52 }
 0x931   : > { %v1611_v59 = vadd.f32 %v1610_v58, %v1602_v52 }
 0x933   : > { %v1612_v60 = vmul.f32 0.7978846, %v1611_v59 }
 0x935   : > { %2286 = vtanh.f32 %v1612_v60 }
 0x942   : > { %v2287_v61 = vpop.eup %2286 }
 0x943   : > { %v1614_v62 = vadd.f32 1.0, %v2287_v61 }
 0x945   : > { %v1615_v63 = vmul.f32 %v1614_v62, %v1607_v9 }
 0x947   : > { %v1632_v0 = vpack.c.bf16 %v1615_v63, %v1615_v63 }
 0x949   : > { %2224 = vmatmul.mubr.bf16.vlgmr.msra.gmra.mxu1 %v1632_v0 }
 0xa09   : > { %v1722_v3 = vpop.f32.mrf.mxu1 }
 0xa0a   : > { %v1723_v4 = vadd.f32 %v2076_v2, %v1722_v3 }
 0xa0b   : > { %v2225_v5 = vpop.f32.mrf.mxu1 }
 0xa0c   : > { %v1728_v6 = vadd.f32 %v1723_v4, %v2667_v22  ;;  %v1762_v22 = vstv %s1761_s20 }
 0xa0d   : > { %v1725_v7 = vpop.f32.mrf.mxu1  ;;  %vm1763_vm9 = vcmp.eq.s32.totalorder %v1762_v22, 1 }
 0xa0e   : > { %v1733_v8 = vsel %vm841_vm1, %v1728_v6, 0.0 }
 0xa0f   : > { %1734 = vadd.xlane.f32.xlu0 %v1733_v8  ;;  %v2226_v10 = vpop.f32.mrf.mxu1 }
 0xa98   : > { %v1735_v11 = vpop.xlane.xlu0 %1734 }
 0xa99   : > { %v1736_v12 = vmul.f32 0.03125, %v1735_v11 }
 0xa9b   : > { %v1737_v13 = vsub.f32 %v1728_v6, %v1736_v12 }
 0xa9d   : > { %v1738_v14 = vmul.f32 %v1737_v13, %v1737_v13 }
 0xa9f   : > { %v1739_v15 = vsel %vm841_vm1, %v1738_v14, 0.0 }
 0xaa0   : > { %1740 = vadd.xlane.f32.xlu1 %v1739_v15 }
 0xb29   : > { %v1741_v16 = vpop.xlane.xlu1 %1740 }
 0xb2a   : > { %v1742_v17 = vmul.f32 0.03125, %v1741_v16 }
 0xb2c   : > { %v1743_v18 = vadd.f32 1e-05, %v1742_v17 }
 0xb2e   : > { %2288 = vrsqrt.f32 %v1743_v18 }
 0xb3b   : > { %v2289_v19 = vpop.eup %2288 }
 0xb3c   : > { %v1745_v21 = vmul.f32 %v2289_v19, %v1737_v13 }
 0xb3e   : > { %v1752_v25 = vmul.f32 %v2087_v20, %v1745_v21 }
 0xb40   : > { %v1759_v26 = vadd.f32 %v2088_v23, %v1752_v25 }
 0xb42   : > { %v1764_v24 = vsel %vm1763_vm9, %v1759_v26, %v1728_v6 }
 0xb43   : > { %1765 = vst.msk [vmem:[#allocation5] sm:$0xff] %vm841_vm1, %v1764_v24 }
 0xb44   : > { %2303 = shalt.err (!%p2300_p12)
}
 0xb45   : > { %s2796_s1 = sld [smem:[#allocation20_spill]] }
 0xb4b   : > { %2228 = dma.vmem_to_hbm [thread:$0]  (%p1760_p5), %s1786_s14, 128, %s2796_s1, [#allocation6]  }
 0xb4c   : > { %2319 = dma.done.wait (%p1760_p5), [#allocation6], 128  }
 0xb4d   : > { %2321 = vsyncadd (%p1760_p5), [#allocation6], 4294967168 }
 0xb4e PF: > { %s2797_s5 = sld [smem:[#allocation8_spill]] }
 0xb54   : > { %s31_s0 = sadd.s32 1, %s2797_s5  }
 0xb55   : > { %p28_p13 = scmp.ge.s32.totalorder %s31_s0, 4  }
 0xb57   :  { %30 = sbr.rel (!%p28_p13) target bundleno = 13 (0xd), region = 182 }
 0xb5c   :  { %1822 = vsyncpa [#allocation6], 1 }
 0xb5d   :  { %1824 = vsyncpa [#allocation6 + $0x1], 1 }

</bundles_post_ra>
